<compile_context>
chip_gen: v7x
topology: tpu7x:2x2x1
jax: 0.10.0
libtpu: 0.0.40
codegen_flags: <defaults>
</compile_context>

<pallas_src>
import functools
import math

import jax
import jax.numpy as jnp
from jax.experimental import pallas as pl
from jax.experimental.pallas import tpu as pltpu

_INV_SQRT2 = 1.0 / math.sqrt(2.0)
_LN_EPS = 1e-5


def fusion_kernel(x_img_ref, x_hm_ref, ln_ref,
                  wq1_ref, wk1_ref, wv1_ref, wo1_ref, ba1_ref,
                  wq2_ref, wk2_ref, wv2_ref, wo2_ref, ba2_ref,
                  w1i_ref, b1i_ref, w2i_ref, b2i_ref,
                  w1h_ref, b1h_ref, w2h_ref, b2h_ref,
                  o_img_ref, o_hm_ref, *, num_heads):
    f32 = jnp.float32
    x_img = x_img_ref[...].astype(f32)     # (S_img, D)  (batch dim squeezed)
    x_hm = x_hm_ref[...].astype(f32)       # (S_hm,  D)
    D = x_img.shape[-1]
    hd = D // num_heads
    scale = 1.0 / math.sqrt(hd)
    ln = ln_ref[...]                        # (12, D): interleaved (gamma, beta)

    def layernorm(x, gi, bi):
        mu = jnp.mean(x, axis=-1, keepdims=True)
        xc = x - mu
        var = jnp.mean(xc * xc, axis=-1, keepdims=True)
        inv = jax.lax.rsqrt(var + _LN_EPS)
        return xc * inv * ln[gi:gi + 1, :] + ln[bi:bi + 1, :]

    def gelu(x):
        # exact erf GELU (nn.GELU() default)
        return 0.5 * x * (1.0 + jax.lax.erf(x * _INV_SQRT2))

    def mha(q_in, kv_in, wq_ref, wk_ref, wv_ref, wo_ref, ba_ref):
        ba = ba_ref[...]                    # (4, D): rows = bq, bk, bv, bo
        q = jnp.dot(q_in, wq_ref[...], preferred_element_type=f32) + ba[0:1, :]
        k = jnp.dot(kv_in, wk_ref[...], preferred_element_type=f32) + ba[1:2, :]
        v = jnp.dot(kv_in, wv_ref[...], preferred_element_type=f32) + ba[2:3, :]
        wo = wo_ref[...]
        out = jnp.zeros((q_in.shape[0], D), dtype=f32)
        # Statically unrolled head loop. Each head's (Sq, hd) output is pushed
        # straight through its out-proj row block, keeping the accumulator a
        # lane-dense (Sq, D) tile (no concatenation of hd-wide slices).
        for h in range(num_heads):
            lo, hi = h * hd, (h + 1) * hd
            qh = q[:, lo:hi]
            kh = k[:, lo:hi]
            vh = v[:, lo:hi]
            s = jnp.dot(qh, kh.T, preferred_element_type=f32) * scale
            s = s - jnp.max(s, axis=-1, keepdims=True)
            p = jnp.exp(s)
            p = p / jnp.sum(p, axis=-1, keepdims=True)
            oh = jnp.dot(p, vh, preferred_element_type=f32)           # (Sq, hd)
            out = out + jnp.dot(oh, wo[lo:hi, :], preferred_element_type=f32)
        return out + ba[3:4, :]

    def mlp(x, w1_ref, b1_ref, w2_ref, b2_ref):
        h = jnp.dot(x, w1_ref[...], preferred_element_type=f32) + b1_ref[...]
        h = gelu(h)
        return jnp.dot(h, w2_ref[...], preferred_element_type=f32) + b2_ref[...]

    # --- cross attention: image queries attend to heatmap tokens -------------
    img_q = layernorm(x_img, 0, 1)          # norm_img_q
    hm_kv = layernorm(x_hm, 2, 3)           # norm_hm_kv
    x_img = x_img + mha(img_q, hm_kv, wq1_ref, wk1_ref, wv1_ref, wo1_ref, ba1_ref)

    # --- cross attention: heatmap queries attend to (updated) image tokens ---
    hm_q = layernorm(x_hm, 4, 5)            # norm_hm_q
    img_kv = layernorm(x_img, 6, 7)         # norm_img_kv  (uses updated x_img)
    x_hm = x_hm + mha(hm_q, img_kv, wq2_ref, wk2_ref, wv2_ref, wo2_ref, ba2_ref)

    # --- per-stream MLPs with residual ---------------------------------------
    x_img = x_img + mlp(layernorm(x_img, 8, 9), w1i_ref, b1i_ref, w2i_ref, b2i_ref)
    x_hm = x_hm + mlp(layernorm(x_hm, 10, 11), w1h_ref, b1h_ref, w2h_ref, b2h_ref)

    o_img_ref[...] = x_img.astype(o_img_ref.dtype)
    o_hm_ref[...] = x_hm.astype(o_hm_ref.dtype)


def cross_modal_fusion_block(x_img, x_hm, params, num_heads):
    """x_img: (B, S_img, D), x_hm: (B, S_hm, D). Returns (y_img, y_hm)."""
    (ln, wq1, wk1, wv1, wo1, ba1, wq2, wk2, wv2, wo2, ba2,
     w1i, b1i, w2i, b2i, w1h, b1h, w2h, b2h) = params
    B, S_img, D = x_img.shape
    Bh, S_hm, Dh = x_hm.shape
    assert B == Bh and D == Dh and D % num_heads == 0

    weights = (ln, wq1, wk1, wv1, wo1, ba1, wq2, wk2, wv2, wo2, ba2,
               w1i, b1i, w2i, b2i, w1h, b1h, w2h, b2h)

    in_specs = [
        # batch dim squeezed out of the kernel view
        pl.BlockSpec((None, S_img, D), lambda b: (b, 0, 0)),
        pl.BlockSpec((None, S_hm, D), lambda b: (b, 0, 0)),
    ] + [
        # all weights/LN params: full blocks, constant index_map -> resident
        pl.BlockSpec(w.shape, lambda b: (0, 0)) for w in weights
    ]

    out_specs = [
        pl.BlockSpec((None, S_img, D), lambda b: (b, 0, 0)),
        pl.BlockSpec((None, S_hm, D), lambda b: (b, 0, 0)),
    ]

    out_shape = (jax.ShapeDtypeStruct((B, S_img, D), x_img.dtype),
                 jax.ShapeDtypeStruct((B, S_hm, D), x_hm.dtype))

    kernel = functools.partial(fusion_kernel, num_heads=num_heads)

    return pl.pallas_call(
        kernel,
        out_shape=out_shape,
        grid_spec=pltpu.PrefetchScalarGridSpec(
            num_scalar_prefetch=0,
            grid=(B,),
            in_specs=in_specs,
            out_specs=out_specs,
        ),
        compiler_params=pltpu.CompilerParams(
            dimension_semantics=("parallel",)),
    )(x_img, x_hm, *weights)


def init_params(key, embed_dim, mlp_ratio):
    """Deterministic small-uniform init (PyTorch-ish 1/sqrt(fan_in) bounds)."""
    D = embed_dim
    Hm = int(D * mlp_ratio)
    keys = iter(jax.random.split(key, 40))

    def unif(shape, fan_in):
        bound = 1.0 / math.sqrt(fan_in)
        return jax.random.uniform(next(keys), shape, jnp.float32, -bound, bound)

    # 6 LayerNorms, interleaved (gamma, beta) rows -> (12, D)
    gammas = 1.0 + 0.05 * jax.random.normal(next(keys), (6, D), jnp.float32)
    betas = 0.05 * jax.random.normal(next(keys), (6, D), jnp.float32)
    ln = jnp.stack([gammas, betas], axis=1).reshape(12, D)

    def attn_params():
        wq = unif((D, D), D)
        wk = unif((D, D), D)
        wv = unif((D, D), D)
        wo = unif((D, D), D)
        ba = unif((4, D), D)   # rows: bq, bk, bv, bo
        return wq, wk, wv, wo, ba

    wq1, wk1, wv1, wo1, ba1 = attn_params()
    wq2, wk2, wv2, wo2, ba2 = attn_params()

    def mlp_params():
        w1 = unif((D, Hm), D)
        b1 = unif((1, Hm), D)
        w2 = unif((Hm, D), Hm)
        b2 = unif((1, D), Hm)
        return w1, b1, w2, b2

    w1i, b1i, w2i, b2i = mlp_params()
    w1h, b1h, w2h, b2h = mlp_params()

    return (ln, wq1, wk1, wv1, wo1, ba1, wq2, wk2, wv2, wo2, ba2,
            w1i, b1i, w2i, b2i, w1h, b1h, w2h, b2h)


def ref_forward(x_img, x_hm, params, num_heads):
    """Plain-JAX reference reproducing the PyTorch forward (eval mode)."""
    (ln, wq1, wk1, wv1, wo1, ba1, wq2, wk2, wv2, wo2, ba2,
     w1i, b1i, w2i, b2i, w1h, b1h, w2h, b2h) = params
    hp = jax.lax.Precision.HIGHEST

    def layernorm(x, g, b):
        mu = jnp.mean(x, axis=-1, keepdims=True)
        var = jnp.mean((x - mu) ** 2, axis=-1, keepdims=True)
        return (x - mu) * jax.lax.rsqrt(var + _LN_EPS) * g + b

    def gelu(x):
        return 0.5 * x * (1.0 + jax.lax.erf(x * _INV_SQRT2))

    def mha(q_in, kv_in, wq, wk, wv, wo, ba):
        B, Sq, D = q_in.shape
        Sk = kv_in.shape[1]
        hd = D // num_heads
        q = jnp.einsum('bsd,de->bse', q_in, wq, precision=hp) + ba[0]
        k = jnp.einsum('bsd,de->bse', kv_in, wk, precision=hp) + ba[1]
        v = jnp.einsum('bsd,de->bse', kv_in, wv, precision=hp) + ba[2]
        q = q.reshape(B, Sq, num_heads, hd)
        k = k.reshape(B, Sk, num_heads, hd)
        v = v.reshape(B, Sk, num_heads, hd)
        s = jnp.einsum('bqhd,bkhd->bhqk', q, k, precision=hp) / math.sqrt(hd)
        p = jax.nn.softmax(s, axis=-1)
        o = jnp.einsum('bhqk,bkhd->bqhd', p, v, precision=hp).reshape(B, Sq, D)
        return jnp.einsum('bsd,de->bse', o, wo, precision=hp) + ba[3]

    def mlp(x, w1, b1, w2, b2):
        h = gelu(jnp.einsum('bsd,dh->bsh', x, w1, precision=hp) + b1)
        return jnp.einsum('bsh,hd->bsd', h, w2, precision=hp) + b2

    img_q = layernorm(x_img, ln[0], ln[1])
    hm_kv = layernorm(x_hm, ln[2], ln[3])
    x_img = x_img + mha(img_q, hm_kv, wq1, wk1, wv1, wo1, ba1)

    hm_q = layernorm(x_hm, ln[4], ln[5])
    img_kv = layernorm(x_img, ln[6], ln[7])
    x_hm = x_hm + mha(hm_q, img_kv, wq2, wk2, wv2, wo2, ba2)

    x_img = x_img + mlp(layernorm(x_img, ln[8], ln[9]), w1i, b1i, w2i, b2i)
    x_hm = x_hm + mlp(layernorm(x_hm, ln[10], ln[11]), w1h, b1h, w2h, b2h)
    return x_img, x_hm


if __name__ == "__main__":
    B = 2
    S_img = 16
    S_hm = 8
    embed_dim = 32
    num_heads = 4
    mlp_ratio = 4.0

    key = jax.random.PRNGKey(0)
    key, k_img, k_hm, k_par = jax.random.split(key, 4)
    x_img = jax.random.normal(k_img, (B, S_img, embed_dim), jnp.float32)
    x_hm = jax.random.normal(k_hm, (B, S_hm, embed_dim), jnp.float32)
    params = init_params(k_par, embed_dim, mlp_ratio)

    y_img, y_hm = cross_modal_fusion_block(x_img, x_hm, params, num_heads)
    y_img = jax.block_until_ready(y_img)
    y_hm = jax.block_until_ready(y_hm)

    r_img, r_hm = ref_forward(x_img, x_hm, params, num_heads)
    assert y_img.shape == (B, S_img, embed_dim)
    assert y_hm.shape == (B, S_hm, embed_dim)
    assert jnp.allclose(y_img, r_img, atol=2e-3, rtol=2e-3), \
        float(jnp.max(jnp.abs(y_img - r_img)))
    assert jnp.allclose(y_hm, r_hm, atol=2e-3, rtol=2e-3), \
        float(jnp.max(jnp.abs(y_hm - r_hm)))

    print("KERNEL_OK")
</pallas_src>

<mosaic_0001>
module attributes {stable_mosaic.version = 11 : i64} {
  func.func @fusion_kernel(%arg0: i32, %arg1: memref<1x16x32xf32, #tpu.memory_space<vmem>>, %arg2: memref<1x8x32xf32, #tpu.memory_space<vmem>>, %arg3: memref<12x32xf32, #tpu.memory_space<vmem>>, %arg4: memref<32x32xf32, #tpu.memory_space<vmem>>, %arg5: memref<32x32xf32, #tpu.memory_space<vmem>>, %arg6: memref<32x32xf32, #tpu.memory_space<vmem>>, %arg7: memref<32x32xf32, #tpu.memory_space<vmem>>, %arg8: memref<4x32xf32, #tpu.memory_space<vmem>>, %arg9: memref<32x32xf32, #tpu.memory_space<vmem>>, %arg10: memref<32x32xf32, #tpu.memory_space<vmem>>, %arg11: memref<32x32xf32, #tpu.memory_space<vmem>>, %arg12: memref<32x32xf32, #tpu.memory_space<vmem>>, %arg13: memref<4x32xf32, #tpu.memory_space<vmem>>, %arg14: memref<32x128xf32, #tpu.memory_space<vmem>>, %arg15: memref<1x128xf32, #tpu.memory_space<vmem>>, %arg16: memref<128x32xf32, #tpu.memory_space<vmem>>, %arg17: memref<1x32xf32, #tpu.memory_space<vmem>>, %arg18: memref<32x128xf32, #tpu.memory_space<vmem>>, %arg19: memref<1x128xf32, #tpu.memory_space<vmem>>, %arg20: memref<128x32xf32, #tpu.memory_space<vmem>>, %arg21: memref<1x32xf32, #tpu.memory_space<vmem>>, %arg22: memref<1x16x32xf32, #tpu.memory_space<vmem>>, %arg23: memref<1x8x32xf32, #tpu.memory_space<vmem>>) attributes {dimension_semantics = [#tpu.dimension_semantics<parallel>], iteration_bounds = array<i64: 2>, scalar_prefetch = 0 : i64, scratch_operands = 0 : i64, tpu.core_type = #tpu.core_type<tc>, window_params = [{transform_indices = @transform_0, window_bounds = array<i64: 1, 16, 32>}, {transform_indices = @transform_1, window_bounds = array<i64: 1, 8, 32>}, {pipeline_mode = #tpu.pipeline_mode<synchronous>, transform_indices = @transform_2, window_bounds = array<i64: 12, 32>}, {pipeline_mode = #tpu.pipeline_mode<synchronous>, transform_indices = @transform_3, window_bounds = array<i64: 32, 32>}, {pipeline_mode = #tpu.pipeline_mode<synchronous>, transform_indices = @transform_4, window_bounds = array<i64: 32, 32>}, {pipeline_mode = #tpu.pipeline_mode<synchronous>, transform_indices = @transform_5, window_bounds = array<i64: 32, 32>}, {pipeline_mode = #tpu.pipeline_mode<synchronous>, transform_indices = @transform_6, window_bounds = array<i64: 32, 32>}, {pipeline_mode = #tpu.pipeline_mode<synchronous>, transform_indices = @transform_7, window_bounds = array<i64: 4, 32>}, {pipeline_mode = #tpu.pipeline_mode<synchronous>, transform_indices = @transform_8, window_bounds = array<i64: 32, 32>}, {pipeline_mode = #tpu.pipeline_mode<synchronous>, transform_indices = @transform_9, window_bounds = array<i64: 32, 32>}, {pipeline_mode = #tpu.pipeline_mode<synchronous>, transform_indices = @transform_10, window_bounds = array<i64: 32, 32>}, {pipeline_mode = #tpu.pipeline_mode<synchronous>, transform_indices = @transform_11, window_bounds = array<i64: 32, 32>}, {pipeline_mode = #tpu.pipeline_mode<synchronous>, transform_indices = @transform_12, window_bounds = array<i64: 4, 32>}, {pipeline_mode = #tpu.pipeline_mode<synchronous>, transform_indices = @transform_13, window_bounds = array<i64: 32, 128>}, {pipeline_mode = #tpu.pipeline_mode<synchronous>, transform_indices = @transform_14, window_bounds = array<i64: 1, 128>}, {pipeline_mode = #tpu.pipeline_mode<synchronous>, transform_indices = @transform_15, window_bounds = array<i64: 128, 32>}, {pipeline_mode = #tpu.pipeline_mode<synchronous>, transform_indices = @transform_16, window_bounds = array<i64: 1, 32>}, {pipeline_mode = #tpu.pipeline_mode<synchronous>, transform_indices = @transform_17, window_bounds = array<i64: 32, 128>}, {pipeline_mode = #tpu.pipeline_mode<synchronous>, transform_indices = @transform_18, window_bounds = array<i64: 1, 128>}, {pipeline_mode = #tpu.pipeline_mode<synchronous>, transform_indices = @transform_19, window_bounds = array<i64: 128, 32>}, {pipeline_mode = #tpu.pipeline_mode<synchronous>, transform_indices = @transform_20, window_bounds = array<i64: 1, 32>}, {transform_indices = @transform_21, window_bounds = array<i64: 1, 16, 32>}, {transform_indices = @transform_22, window_bounds = array<i64: 1, 8, 32>}]} {
    %c0 = arith.constant 0 : index
    %c0_0 = arith.constant 0 : index
    %c0_1 = arith.constant 0 : index
    %0 = vector.load %arg1[%c0, %c0_0, %c0_1] : memref<1x16x32xf32, #tpu.memory_space<vmem>>, vector<1x16x32xf32>
    %1 = vector.shape_cast %0 : vector<1x16x32xf32> to vector<16x32xf32>
    %c0_2 = arith.constant 0 : index
    %c0_3 = arith.constant 0 : index
    %c0_4 = arith.constant 0 : index
    %2 = vector.load %arg2[%c0_2, %c0_3, %c0_4] : memref<1x8x32xf32, #tpu.memory_space<vmem>>, vector<1x8x32xf32>
    %3 = vector.shape_cast %2 : vector<1x8x32xf32> to vector<8x32xf32>
    %c0_5 = arith.constant 0 : index
    %c0_6 = arith.constant 0 : index
    %4 = vector.load %arg3[%c0_5, %c0_6] : memref<12x32xf32, #tpu.memory_space<vmem>>, vector<12x32xf32>
    %cst = arith.constant dense<0.000000e+00> : vector<16xf32>
    %5 = vector.multi_reduction <add>, %1, %cst [1] : vector<16x32xf32> to vector<16xf32>
    %6 = vector.shape_cast %5 : vector<16xf32> to vector<16x1xf32>
    %cst_7 = arith.constant 3.200000e+01 : f32
    %7 = vector.broadcast %cst_7 : f32 to vector<16x1xf32>
    %8 = arith.divf %6, %7 : vector<16x1xf32>
    %9 = vector.broadcast %8 : vector<16x1xf32> to vector<16x32xf32>
    %10 = arith.subf %1, %9 : vector<16x32xf32>
    %11 = arith.mulf %10, %10 : vector<16x32xf32>
    %cst_8 = arith.constant dense<0.000000e+00> : vector<16xf32>
    %12 = vector.multi_reduction <add>, %11, %cst_8 [1] : vector<16x32xf32> to vector<16xf32>
    %13 = vector.shape_cast %12 : vector<16xf32> to vector<16x1xf32>
    %cst_9 = arith.constant 3.200000e+01 : f32
    %14 = vector.broadcast %cst_9 : f32 to vector<16x1xf32>
    %15 = arith.divf %13, %14 : vector<16x1xf32>
    %cst_10 = arith.constant 9.99999974E-6 : f32
    %16 = vector.broadcast %cst_10 : f32 to vector<16x1xf32>
    %17 = arith.addf %15, %16 : vector<16x1xf32>
    %18 = math.rsqrt %17 : vector<16x1xf32>
    %19 = vector.broadcast %18 : vector<16x1xf32> to vector<16x32xf32>
    %20 = arith.mulf %10, %19 : vector<16x32xf32>
    %21 = vector.extract_strided_slice %4 {offsets = [0, 0], sizes = [1, 32], strides = [1, 1]} : vector<12x32xf32> to vector<1x32xf32>
    %22 = vector.broadcast %21 : vector<1x32xf32> to vector<16x32xf32>
    %23 = arith.mulf %20, %22 : vector<16x32xf32>
    %24 = vector.extract_strided_slice %4 {offsets = [1, 0], sizes = [1, 32], strides = [1, 1]} : vector<12x32xf32> to vector<1x32xf32>
    %25 = vector.broadcast %24 : vector<1x32xf32> to vector<16x32xf32>
    %26 = arith.addf %23, %25 : vector<16x32xf32>
    %cst_11 = arith.constant dense<0.000000e+00> : vector<8xf32>
    %27 = vector.multi_reduction <add>, %3, %cst_11 [1] : vector<8x32xf32> to vector<8xf32>
    %28 = vector.shape_cast %27 : vector<8xf32> to vector<8x1xf32>
    %cst_12 = arith.constant 3.200000e+01 : f32
    %29 = vector.broadcast %cst_12 : f32 to vector<8x1xf32>
    %30 = arith.divf %28, %29 : vector<8x1xf32>
    %31 = vector.broadcast %30 : vector<8x1xf32> to vector<8x32xf32>
    %32 = arith.subf %3, %31 : vector<8x32xf32>
    %33 = arith.mulf %32, %32 : vector<8x32xf32>
    %cst_13 = arith.constant dense<0.000000e+00> : vector<8xf32>
    %34 = vector.multi_reduction <add>, %33, %cst_13 [1] : vector<8x32xf32> to vector<8xf32>
    %35 = vector.shape_cast %34 : vector<8xf32> to vector<8x1xf32>
    %cst_14 = arith.constant 3.200000e+01 : f32
    %36 = vector.broadcast %cst_14 : f32 to vector<8x1xf32>
    %37 = arith.divf %35, %36 : vector<8x1xf32>
    %cst_15 = arith.constant 9.99999974E-6 : f32
    %38 = vector.broadcast %cst_15 : f32 to vector<8x1xf32>
    %39 = arith.addf %37, %38 : vector<8x1xf32>
    %40 = math.rsqrt %39 : vector<8x1xf32>
    %41 = vector.broadcast %40 : vector<8x1xf32> to vector<8x32xf32>
    %42 = arith.mulf %32, %41 : vector<8x32xf32>
    %43 = vector.extract_strided_slice %4 {offsets = [2, 0], sizes = [1, 32], strides = [1, 1]} : vector<12x32xf32> to vector<1x32xf32>
    %44 = vector.broadcast %43 : vector<1x32xf32> to vector<8x32xf32>
    %45 = arith.mulf %42, %44 : vector<8x32xf32>
    %46 = vector.extract_strided_slice %4 {offsets = [3, 0], sizes = [1, 32], strides = [1, 1]} : vector<12x32xf32> to vector<1x32xf32>
    %47 = vector.broadcast %46 : vector<1x32xf32> to vector<8x32xf32>
    %48 = arith.addf %45, %47 : vector<8x32xf32>
    %c0_16 = arith.constant 0 : index
    %c0_17 = arith.constant 0 : index
    %49 = vector.load %arg8[%c0_16, %c0_17] : memref<4x32xf32, #tpu.memory_space<vmem>>, vector<4x32xf32>
    %c0_18 = arith.constant 0 : index
    %c0_19 = arith.constant 0 : index
    %50 = vector.load %arg4[%c0_18, %c0_19] : memref<32x32xf32, #tpu.memory_space<vmem>>, vector<32x32xf32>
    %cst_20 = arith.constant dense<0.000000e+00> : vector<16x32xf32>
    %51 = tpu.matmul %26, %50, %cst_20 {dimension_numbers = #tpu.dot_dimension_numbers<[1], [0], [0], [1], [0, 0, 1, 1], [], []>} : vector<16x32xf32>, vector<32x32xf32>, vector<16x32xf32> -> vector<16x32xf32>
    %52 = vector.extract_strided_slice %49 {offsets = [0, 0], sizes = [1, 32], strides = [1, 1]} : vector<4x32xf32> to vector<1x32xf32>
    %53 = vector.broadcast %52 : vector<1x32xf32> to vector<16x32xf32>
    %54 = arith.addf %51, %53 : vector<16x32xf32>
    %c0_21 = arith.constant 0 : index
    %c0_22 = arith.constant 0 : index
    %55 = vector.load %arg5[%c0_21, %c0_22] : memref<32x32xf32, #tpu.memory_space<vmem>>, vector<32x32xf32>
    %cst_23 = arith.constant dense<0.000000e+00> : vector<8x32xf32>
    %56 = tpu.matmul %48, %55, %cst_23 {dimension_numbers = #tpu.dot_dimension_numbers<[1], [0], [0], [1], [0, 0, 1, 1], [], []>} : vector<8x32xf32>, vector<32x32xf32>, vector<8x32xf32> -> vector<8x32xf32>
    %57 = vector.extract_strided_slice %49 {offsets = [1, 0], sizes = [1, 32], strides = [1, 1]} : vector<4x32xf32> to vector<1x32xf32>
    %58 = vector.broadcast %57 : vector<1x32xf32> to vector<8x32xf32>
    %59 = arith.addf %56, %58 : vector<8x32xf32>
    %c0_24 = arith.constant 0 : index
    %c0_25 = arith.constant 0 : index
    %60 = vector.load %arg6[%c0_24, %c0_25] : memref<32x32xf32, #tpu.memory_space<vmem>>, vector<32x32xf32>
    %cst_26 = arith.constant dense<0.000000e+00> : vector<8x32xf32>
    %61 = tpu.matmul %48, %60, %cst_26 {dimension_numbers = #tpu.dot_dimension_numbers<[1], [0], [0], [1], [0, 0, 1, 1], [], []>} : vector<8x32xf32>, vector<32x32xf32>, vector<8x32xf32> -> vector<8x32xf32>
    %62 = vector.extract_strided_slice %49 {offsets = [2, 0], sizes = [1, 32], strides = [1, 1]} : vector<4x32xf32> to vector<1x32xf32>
    %63 = vector.broadcast %62 : vector<1x32xf32> to vector<8x32xf32>
    %64 = arith.addf %61, %63 : vector<8x32xf32>
    %c0_27 = arith.constant 0 : index
    %c0_28 = arith.constant 0 : index
    %65 = vector.load %arg7[%c0_27, %c0_28] : memref<32x32xf32, #tpu.memory_space<vmem>>, vector<32x32xf32>
    %cst_29 = arith.constant 0.000000e+00 : f32
    %66 = vector.broadcast %cst_29 : f32 to vector<16x32xf32>
    %67 = vector.extract_strided_slice %54 {offsets = [0, 0], sizes = [16, 8], strides = [1, 1]} : vector<16x32xf32> to vector<16x8xf32>
    %68 = vector.extract_strided_slice %59 {offsets = [0, 0], sizes = [8, 8], strides = [1, 1]} : vector<8x32xf32> to vector<8x8xf32>
    %69 = vector.extract_strided_slice %64 {offsets = [0, 0], sizes = [8, 8], strides = [1, 1]} : vector<8x32xf32> to vector<8x8xf32>
    %70 = tpu.transpose %68, [1, 0] : vector<8x8xf32> -> vector<8x8xf32>
    %cst_30 = arith.constant dense<0.000000e+00> : vector<16x8xf32>
    %71 = tpu.matmul %67, %70, %cst_30 {dimension_numbers = #tpu.dot_dimension_numbers<[1], [0], [0], [1], [0, 0, 1, 1], [], []>} : vector<16x8xf32>, vector<8x8xf32>, vector<16x8xf32> -> vector<16x8xf32>
    %cst_31 = arith.constant 0.353553385 : f32
    %72 = vector.broadcast %cst_31 : f32 to vector<16x8xf32>
    %73 = arith.mulf %71, %72 : vector<16x8xf32>
    %cst_32 = arith.constant dense<0xFF800000> : vector<16xf32>
    %74 = vector.multi_reduction <maximumf>, %73, %cst_32 [1] : vector<16x8xf32> to vector<16xf32>
    %75 = vector.shape_cast %74 : vector<16xf32> to vector<16x1xf32>
    %76 = vector.broadcast %75 : vector<16x1xf32> to vector<16x8xf32>
    %77 = arith.subf %73, %76 : vector<16x8xf32>
    %78 = math.exp %77 : vector<16x8xf32>
    %cst_33 = arith.constant dense<0.000000e+00> : vector<16xf32>
    %79 = vector.multi_reduction <add>, %78, %cst_33 [1] : vector<16x8xf32> to vector<16xf32>
    %80 = vector.shape_cast %79 : vector<16xf32> to vector<16x1xf32>
    %81 = vector.broadcast %80 : vector<16x1xf32> to vector<16x8xf32>
    %82 = arith.divf %78, %81 : vector<16x8xf32>
    %cst_34 = arith.constant dense<0.000000e+00> : vector<16x8xf32>
    %83 = tpu.matmul %82, %69, %cst_34 {dimension_numbers = #tpu.dot_dimension_numbers<[1], [0], [0], [1], [0, 0, 1, 1], [], []>} : vector<16x8xf32>, vector<8x8xf32>, vector<16x8xf32> -> vector<16x8xf32>
    %84 = vector.extract_strided_slice %65 {offsets = [0, 0], sizes = [8, 32], strides = [1, 1]} : vector<32x32xf32> to vector<8x32xf32>
    %cst_35 = arith.constant dense<0.000000e+00> : vector<16x32xf32>
    %85 = tpu.matmul %83, %84, %cst_35 {dimension_numbers = #tpu.dot_dimension_numbers<[1], [0], [0], [1], [0, 0, 1, 1], [], []>} : vector<16x8xf32>, vector<8x32xf32>, vector<16x32xf32> -> vector<16x32xf32>
    %86 = arith.addf %66, %85 : vector<16x32xf32>
    %87 = vector.extract_strided_slice %54 {offsets = [0, 8], sizes = [16, 8], strides = [1, 1]} : vector<16x32xf32> to vector<16x8xf32>
    %88 = vector.extract_strided_slice %59 {offsets = [0, 8], sizes = [8, 8], strides = [1, 1]} : vector<8x32xf32> to vector<8x8xf32>
    %89 = vector.extract_strided_slice %64 {offsets = [0, 8], sizes = [8, 8], strides = [1, 1]} : vector<8x32xf32> to vector<8x8xf32>
    %90 = tpu.transpose %88, [1, 0] : vector<8x8xf32> -> vector<8x8xf32>
    %cst_36 = arith.constant dense<0.000000e+00> : vector<16x8xf32>
    %91 = tpu.matmul %87, %90, %cst_36 {dimension_numbers = #tpu.dot_dimension_numbers<[1], [0], [0], [1], [0, 0, 1, 1], [], []>} : vector<16x8xf32>, vector<8x8xf32>, vector<16x8xf32> -> vector<16x8xf32>
    %cst_37 = arith.constant 0.353553385 : f32
    %92 = vector.broadcast %cst_37 : f32 to vector<16x8xf32>
    %93 = arith.mulf %91, %92 : vector<16x8xf32>
    %cst_38 = arith.constant dense<0xFF800000> : vector<16xf32>
    %94 = vector.multi_reduction <maximumf>, %93, %cst_38 [1] : vector<16x8xf32> to vector<16xf32>
    %95 = vector.shape_cast %94 : vector<16xf32> to vector<16x1xf32>
    %96 = vector.broadcast %95 : vector<16x1xf32> to vector<16x8xf32>
    %97 = arith.subf %93, %96 : vector<16x8xf32>
    %98 = math.exp %97 : vector<16x8xf32>
    %cst_39 = arith.constant dense<0.000000e+00> : vector<16xf32>
    %99 = vector.multi_reduction <add>, %98, %cst_39 [1] : vector<16x8xf32> to vector<16xf32>
    %100 = vector.shape_cast %99 : vector<16xf32> to vector<16x1xf32>
    %101 = vector.broadcast %100 : vector<16x1xf32> to vector<16x8xf32>
    %102 = arith.divf %98, %101 : vector<16x8xf32>
    %cst_40 = arith.constant dense<0.000000e+00> : vector<16x8xf32>
    %103 = tpu.matmul %102, %89, %cst_40 {dimension_numbers = #tpu.dot_dimension_numbers<[1], [0], [0], [1], [0, 0, 1, 1], [], []>} : vector<16x8xf32>, vector<8x8xf32>, vector<16x8xf32> -> vector<16x8xf32>
    %104 = vector.extract_strided_slice %65 {offsets = [8, 0], sizes = [8, 32], strides = [1, 1]} : vector<32x32xf32> to vector<8x32xf32>
    %cst_41 = arith.constant dense<0.000000e+00> : vector<16x32xf32>
    %105 = tpu.matmul %103, %104, %cst_41 {dimension_numbers = #tpu.dot_dimension_numbers<[1], [0], [0], [1], [0, 0, 1, 1], [], []>} : vector<16x8xf32>, vector<8x32xf32>, vector<16x32xf32> -> vector<16x32xf32>
    %106 = arith.addf %86, %105 : vector<16x32xf32>
    %107 = vector.extract_strided_slice %54 {offsets = [0, 16], sizes = [16, 8], strides = [1, 1]} : vector<16x32xf32> to vector<16x8xf32>
    %108 = vector.extract_strided_slice %59 {offsets = [0, 16], sizes = [8, 8], strides = [1, 1]} : vector<8x32xf32> to vector<8x8xf32>
    %109 = vector.extract_strided_slice %64 {offsets = [0, 16], sizes = [8, 8], strides = [1, 1]} : vector<8x32xf32> to vector<8x8xf32>
    %110 = tpu.transpose %108, [1, 0] : vector<8x8xf32> -> vector<8x8xf32>
    %cst_42 = arith.constant dense<0.000000e+00> : vector<16x8xf32>
    %111 = tpu.matmul %107, %110, %cst_42 {dimension_numbers = #tpu.dot_dimension_numbers<[1], [0], [0], [1], [0, 0, 1, 1], [], []>} : vector<16x8xf32>, vector<8x8xf32>, vector<16x8xf32> -> vector<16x8xf32>
    %cst_43 = arith.constant 0.353553385 : f32
    %112 = vector.broadcast %cst_43 : f32 to vector<16x8xf32>
    %113 = arith.mulf %111, %112 : vector<16x8xf32>
    %cst_44 = arith.constant dense<0xFF800000> : vector<16xf32>
    %114 = vector.multi_reduction <maximumf>, %113, %cst_44 [1] : vector<16x8xf32> to vector<16xf32>
    %115 = vector.shape_cast %114 : vector<16xf32> to vector<16x1xf32>
    %116 = vector.broadcast %115 : vector<16x1xf32> to vector<16x8xf32>
    %117 = arith.subf %113, %116 : vector<16x8xf32>
    %118 = math.exp %117 : vector<16x8xf32>
    %cst_45 = arith.constant dense<0.000000e+00> : vector<16xf32>
    %119 = vector.multi_reduction <add>, %118, %cst_45 [1] : vector<16x8xf32> to vector<16xf32>
    %120 = vector.shape_cast %119 : vector<16xf32> to vector<16x1xf32>
    %121 = vector.broadcast %120 : vector<16x1xf32> to vector<16x8xf32>
    %122 = arith.divf %118, %121 : vector<16x8xf32>
    %cst_46 = arith.constant dense<0.000000e+00> : vector<16x8xf32>
    %123 = tpu.matmul %122, %109, %cst_46 {dimension_numbers = #tpu.dot_dimension_numbers<[1], [0], [0], [1], [0, 0, 1, 1], [], []>} : vector<16x8xf32>, vector<8x8xf32>, vector<16x8xf32> -> vector<16x8xf32>
    %124 = vector.extract_strided_slice %65 {offsets = [16, 0], sizes = [8, 32], strides = [1, 1]} : vector<32x32xf32> to vector<8x32xf32>
    %cst_47 = arith.constant dense<0.000000e+00> : vector<16x32xf32>
    %125 = tpu.matmul %123, %124, %cst_47 {dimension_numbers = #tpu.dot_dimension_numbers<[1], [0], [0], [1], [0, 0, 1, 1], [], []>} : vector<16x8xf32>, vector<8x32xf32>, vector<16x32xf32> -> vector<16x32xf32>
    %126 = arith.addf %106, %125 : vector<16x32xf32>
    %127 = vector.extract_strided_slice %54 {offsets = [0, 24], sizes = [16, 8], strides = [1, 1]} : vector<16x32xf32> to vector<16x8xf32>
    %128 = vector.extract_strided_slice %59 {offsets = [0, 24], sizes = [8, 8], strides = [1, 1]} : vector<8x32xf32> to vector<8x8xf32>
    %129 = vector.extract_strided_slice %64 {offsets = [0, 24], sizes = [8, 8], strides = [1, 1]} : vector<8x32xf32> to vector<8x8xf32>
    %130 = tpu.transpose %128, [1, 0] : vector<8x8xf32> -> vector<8x8xf32>
    %cst_48 = arith.constant dense<0.000000e+00> : vector<16x8xf32>
    %131 = tpu.matmul %127, %130, %cst_48 {dimension_numbers = #tpu.dot_dimension_numbers<[1], [0], [0], [1], [0, 0, 1, 1], [], []>} : vector<16x8xf32>, vector<8x8xf32>, vector<16x8xf32> -> vector<16x8xf32>
    %cst_49 = arith.constant 0.353553385 : f32
    %132 = vector.broadcast %cst_49 : f32 to vector<16x8xf32>
    %133 = arith.mulf %131, %132 : vector<16x8xf32>
    %cst_50 = arith.constant dense<0xFF800000> : vector<16xf32>
    %134 = vector.multi_reduction <maximumf>, %133, %cst_50 [1] : vector<16x8xf32> to vector<16xf32>
    %135 = vector.shape_cast %134 : vector<16xf32> to vector<16x1xf32>
    %136 = vector.broadcast %135 : vector<16x1xf32> to vector<16x8xf32>
    %137 = arith.subf %133, %136 : vector<16x8xf32>
    %138 = math.exp %137 : vector<16x8xf32>
    %cst_51 = arith.constant dense<0.000000e+00> : vector<16xf32>
    %139 = vector.multi_reduction <add>, %138, %cst_51 [1] : vector<16x8xf32> to vector<16xf32>
    %140 = vector.shape_cast %139 : vector<16xf32> to vector<16x1xf32>
    %141 = vector.broadcast %140 : vector<16x1xf32> to vector<16x8xf32>
    %142 = arith.divf %138, %141 : vector<16x8xf32>
    %cst_52 = arith.constant dense<0.000000e+00> : vector<16x8xf32>
    %143 = tpu.matmul %142, %129, %cst_52 {dimension_numbers = #tpu.dot_dimension_numbers<[1], [0], [0], [1], [0, 0, 1, 1], [], []>} : vector<16x8xf32>, vector<8x8xf32>, vector<16x8xf32> -> vector<16x8xf32>
    %144 = vector.extract_strided_slice %65 {offsets = [24, 0], sizes = [8, 32], strides = [1, 1]} : vector<32x32xf32> to vector<8x32xf32>
    %cst_53 = arith.constant dense<0.000000e+00> : vector<16x32xf32>
    %145 = tpu.matmul %143, %144, %cst_53 {dimension_numbers = #tpu.dot_dimension_numbers<[1], [0], [0], [1], [0, 0, 1, 1], [], []>} : vector<16x8xf32>, vector<8x32xf32>, vector<16x32xf32> -> vector<16x32xf32>
    %146 = arith.addf %126, %145 : vector<16x32xf32>
    %147 = vector.extract_strided_slice %49 {offsets = [3, 0], sizes = [1, 32], strides = [1, 1]} : vector<4x32xf32> to vector<1x32xf32>
    %148 = vector.broadcast %147 : vector<1x32xf32> to vector<16x32xf32>
    %149 = arith.addf %146, %148 : vector<16x32xf32>
    %150 = arith.addf %1, %149 : vector<16x32xf32>
    %cst_54 = arith.constant dense<0.000000e+00> : vector<8xf32>
    %151 = vector.multi_reduction <add>, %3, %cst_54 [1] : vector<8x32xf32> to vector<8xf32>
    %152 = vector.shape_cast %151 : vector<8xf32> to vector<8x1xf32>
    %cst_55 = arith.constant 3.200000e+01 : f32
    %153 = vector.broadcast %cst_55 : f32 to vector<8x1xf32>
    %154 = arith.divf %152, %153 : vector<8x1xf32>
    %155 = vector.broadcast %154 : vector<8x1xf32> to vector<8x32xf32>
    %156 = arith.subf %3, %155 : vector<8x32xf32>
    %157 = arith.mulf %156, %156 : vector<8x32xf32>
    %cst_56 = arith.constant dense<0.000000e+00> : vector<8xf32>
    %158 = vector.multi_reduction <add>, %157, %cst_56 [1] : vector<8x32xf32> to vector<8xf32>
    %159 = vector.shape_cast %158 : vector<8xf32> to vector<8x1xf32>
    %cst_57 = arith.constant 3.200000e+01 : f32
    %160 = vector.broadcast %cst_57 : f32 to vector<8x1xf32>
    %161 = arith.divf %159, %160 : vector<8x1xf32>
    %cst_58 = arith.constant 9.99999974E-6 : f32
    %162 = vector.broadcast %cst_58 : f32 to vector<8x1xf32>
    %163 = arith.addf %161, %162 : vector<8x1xf32>
    %164 = math.rsqrt %163 : vector<8x1xf32>
    %165 = vector.broadcast %164 : vector<8x1xf32> to vector<8x32xf32>
    %166 = arith.mulf %156, %165 : vector<8x32xf32>
    %167 = vector.extract_strided_slice %4 {offsets = [4, 0], sizes = [1, 32], strides = [1, 1]} : vector<12x32xf32> to vector<1x32xf32>
    %168 = vector.broadcast %167 : vector<1x32xf32> to vector<8x32xf32>
    %169 = arith.mulf %166, %168 : vector<8x32xf32>
    %170 = vector.extract_strided_slice %4 {offsets = [5, 0], sizes = [1, 32], strides = [1, 1]} : vector<12x32xf32> to vector<1x32xf32>
    %171 = vector.broadcast %170 : vector<1x32xf32> to vector<8x32xf32>
    %172 = arith.addf %169, %171 : vector<8x32xf32>
    %cst_59 = arith.constant dense<0.000000e+00> : vector<16xf32>
    %173 = vector.multi_reduction <add>, %150, %cst_59 [1] : vector<16x32xf32> to vector<16xf32>
    %174 = vector.shape_cast %173 : vector<16xf32> to vector<16x1xf32>
    %cst_60 = arith.constant 3.200000e+01 : f32
    %175 = vector.broadcast %cst_60 : f32 to vector<16x1xf32>
    %176 = arith.divf %174, %175 : vector<16x1xf32>
    %177 = vector.broadcast %176 : vector<16x1xf32> to vector<16x32xf32>
    %178 = arith.subf %150, %177 : vector<16x32xf32>
    %179 = arith.mulf %178, %178 : vector<16x32xf32>
    %cst_61 = arith.constant dense<0.000000e+00> : vector<16xf32>
    %180 = vector.multi_reduction <add>, %179, %cst_61 [1] : vector<16x32xf32> to vector<16xf32>
    %181 = vector.shape_cast %180 : vector<16xf32> to vector<16x1xf32>
    %cst_62 = arith.constant 3.200000e+01 : f32
    %182 = vector.broadcast %cst_62 : f32 to vector<16x1xf32>
    %183 = arith.divf %181, %182 : vector<16x1xf32>
    %cst_63 = arith.constant 9.99999974E-6 : f32
    %184 = vector.broadcast %cst_63 : f32 to vector<16x1xf32>
    %185 = arith.addf %183, %184 : vector<16x1xf32>
    %186 = math.rsqrt %185 : vector<16x1xf32>
    %187 = vector.broadcast %186 : vector<16x1xf32> to vector<16x32xf32>
    %188 = arith.mulf %178, %187 : vector<16x32xf32>
    %189 = vector.extract_strided_slice %4 {offsets = [6, 0], sizes = [1, 32], strides = [1, 1]} : vector<12x32xf32> to vector<1x32xf32>
    %190 = vector.broadcast %189 : vector<1x32xf32> to vector<16x32xf32>
    %191 = arith.mulf %188, %190 : vector<16x32xf32>
    %192 = vector.extract_strided_slice %4 {offsets = [7, 0], sizes = [1, 32], strides = [1, 1]} : vector<12x32xf32> to vector<1x32xf32>
    %193 = vector.broadcast %192 : vector<1x32xf32> to vector<16x32xf32>
    %194 = arith.addf %191, %193 : vector<16x32xf32>
    %c0_64 = arith.constant 0 : index
    %c0_65 = arith.constant 0 : index
    %195 = vector.load %arg13[%c0_64, %c0_65] : memref<4x32xf32, #tpu.memory_space<vmem>>, vector<4x32xf32>
    %c0_66 = arith.constant 0 : index
    %c0_67 = arith.constant 0 : index
    %196 = vector.load %arg9[%c0_66, %c0_67] : memref<32x32xf32, #tpu.memory_space<vmem>>, vector<32x32xf32>
    %cst_68 = arith.constant dense<0.000000e+00> : vector<8x32xf32>
    %197 = tpu.matmul %172, %196, %cst_68 {dimension_numbers = #tpu.dot_dimension_numbers<[1], [0], [0], [1], [0, 0, 1, 1], [], []>} : vector<8x32xf32>, vector<32x32xf32>, vector<8x32xf32> -> vector<8x32xf32>
    %198 = vector.extract_strided_slice %195 {offsets = [0, 0], sizes = [1, 32], strides = [1, 1]} : vector<4x32xf32> to vector<1x32xf32>
    %199 = vector.broadcast %198 : vector<1x32xf32> to vector<8x32xf32>
    %200 = arith.addf %197, %199 : vector<8x32xf32>
    %c0_69 = arith.constant 0 : index
    %c0_70 = arith.constant 0 : index
    %201 = vector.load %arg10[%c0_69, %c0_70] : memref<32x32xf32, #tpu.memory_space<vmem>>, vector<32x32xf32>
    %cst_71 = arith.constant dense<0.000000e+00> : vector<16x32xf32>
    %202 = tpu.matmul %194, %201, %cst_71 {dimension_numbers = #tpu.dot_dimension_numbers<[1], [0], [0], [1], [0, 0, 1, 1], [], []>} : vector<16x32xf32>, vector<32x32xf32>, vector<16x32xf32> -> vector<16x32xf32>
    %203 = vector.extract_strided_slice %195 {offsets = [1, 0], sizes = [1, 32], strides = [1, 1]} : vector<4x32xf32> to vector<1x32xf32>
    %204 = vector.broadcast %203 : vector<1x32xf32> to vector<16x32xf32>
    %205 = arith.addf %202, %204 : vector<16x32xf32>
    %c0_72 = arith.constant 0 : index
    %c0_73 = arith.constant 0 : index
    %206 = vector.load %arg11[%c0_72, %c0_73] : memref<32x32xf32, #tpu.memory_space<vmem>>, vector<32x32xf32>
    %cst_74 = arith.constant dense<0.000000e+00> : vector<16x32xf32>
    %207 = tpu.matmul %194, %206, %cst_74 {dimension_numbers = #tpu.dot_dimension_numbers<[1], [0], [0], [1], [0, 0, 1, 1], [], []>} : vector<16x32xf32>, vector<32x32xf32>, vector<16x32xf32> -> vector<16x32xf32>
    %208 = vector.extract_strided_slice %195 {offsets = [2, 0], sizes = [1, 32], strides = [1, 1]} : vector<4x32xf32> to vector<1x32xf32>
    %209 = vector.broadcast %208 : vector<1x32xf32> to vector<16x32xf32>
    %210 = arith.addf %207, %209 : vector<16x32xf32>
    %c0_75 = arith.constant 0 : index
    %c0_76 = arith.constant 0 : index
    %211 = vector.load %arg12[%c0_75, %c0_76] : memref<32x32xf32, #tpu.memory_space<vmem>>, vector<32x32xf32>
    %cst_77 = arith.constant 0.000000e+00 : f32
    %212 = vector.broadcast %cst_77 : f32 to vector<8x32xf32>
    %213 = vector.extract_strided_slice %200 {offsets = [0, 0], sizes = [8, 8], strides = [1, 1]} : vector<8x32xf32> to vector<8x8xf32>
    %214 = vector.extract_strided_slice %205 {offsets = [0, 0], sizes = [16, 8], strides = [1, 1]} : vector<16x32xf32> to vector<16x8xf32>
    %215 = vector.extract_strided_slice %210 {offsets = [0, 0], sizes = [16, 8], strides = [1, 1]} : vector<16x32xf32> to vector<16x8xf32>
    %216 = tpu.transpose %214, [1, 0] : vector<16x8xf32> -> vector<8x16xf32>
    %cst_78 = arith.constant dense<0.000000e+00> : vector<8x16xf32>
    %217 = tpu.matmul %213, %216, %cst_78 {dimension_numbers = #tpu.dot_dimension_numbers<[1], [0], [0], [1], [0, 0, 1, 1], [], []>} : vector<8x8xf32>, vector<8x16xf32>, vector<8x16xf32> -> vector<8x16xf32>
    %cst_79 = arith.constant 0.353553385 : f32
    %218 = vector.broadcast %cst_79 : f32 to vector<8x16xf32>
    %219 = arith.mulf %217, %218 : vector<8x16xf32>
    %cst_80 = arith.constant dense<0xFF800000> : vector<8xf32>
    %220 = vector.multi_reduction <maximumf>, %219, %cst_80 [1] : vector<8x16xf32> to vector<8xf32>
    %221 = vector.shape_cast %220 : vector<8xf32> to vector<8x1xf32>
    %222 = vector.broadcast %221 : vector<8x1xf32> to vector<8x16xf32>
    %223 = arith.subf %219, %222 : vector<8x16xf32>
    %224 = math.exp %223 : vector<8x16xf32>
    %cst_81 = arith.constant dense<0.000000e+00> : vector<8xf32>
    %225 = vector.multi_reduction <add>, %224, %cst_81 [1] : vector<8x16xf32> to vector<8xf32>
    %226 = vector.shape_cast %225 : vector<8xf32> to vector<8x1xf32>
    %227 = vector.broadcast %226 : vector<8x1xf32> to vector<8x16xf32>
    %228 = arith.divf %224, %227 : vector<8x16xf32>
    %cst_82 = arith.constant dense<0.000000e+00> : vector<8x8xf32>
    %229 = tpu.matmul %228, %215, %cst_82 {dimension_numbers = #tpu.dot_dimension_numbers<[1], [0], [0], [1], [0, 0, 1, 1], [], []>} : vector<8x16xf32>, vector<16x8xf32>, vector<8x8xf32> -> vector<8x8xf32>
    %230 = vector.extract_strided_slice %211 {offsets = [0, 0], sizes = [8, 32], strides = [1, 1]} : vector<32x32xf32> to vector<8x32xf32>
    %cst_83 = arith.constant dense<0.000000e+00> : vector<8x32xf32>
    %231 = tpu.matmul %229, %230, %cst_83 {dimension_numbers = #tpu.dot_dimension_numbers<[1], [0], [0], [1], [0, 0, 1, 1], [], []>} : vector<8x8xf32>, vector<8x32xf32>, vector<8x32xf32> -> vector<8x32xf32>
    %232 = arith.addf %212, %231 : vector<8x32xf32>
    %233 = vector.extract_strided_slice %200 {offsets = [0, 8], sizes = [8, 8], strides = [1, 1]} : vector<8x32xf32> to vector<8x8xf32>
    %234 = vector.extract_strided_slice %205 {offsets = [0, 8], sizes = [16, 8], strides = [1, 1]} : vector<16x32xf32> to vector<16x8xf32>
    %235 = vector.extract_strided_slice %210 {offsets = [0, 8], sizes = [16, 8], strides = [1, 1]} : vector<16x32xf32> to vector<16x8xf32>
    %236 = tpu.transpose %234, [1, 0] : vector<16x8xf32> -> vector<8x16xf32>
    %cst_84 = arith.constant dense<0.000000e+00> : vector<8x16xf32>
    %237 = tpu.matmul %233, %236, %cst_84 {dimension_numbers = #tpu.dot_dimension_numbers<[1], [0], [0], [1], [0, 0, 1, 1], [], []>} : vector<8x8xf32>, vector<8x16xf32>, vector<8x16xf32> -> vector<8x16xf32>
    %cst_85 = arith.constant 0.353553385 : f32
    %238 = vector.broadcast %cst_85 : f32 to vector<8x16xf32>
    %239 = arith.mulf %237, %238 : vector<8x16xf32>
    %cst_86 = arith.constant dense<0xFF800000> : vector<8xf32>
    %240 = vector.multi_reduction <maximumf>, %239, %cst_86 [1] : vector<8x16xf32> to vector<8xf32>
    %241 = vector.shape_cast %240 : vector<8xf32> to vector<8x1xf32>
    %242 = vector.broadcast %241 : vector<8x1xf32> to vector<8x16xf32>
    %243 = arith.subf %239, %242 : vector<8x16xf32>
    %244 = math.exp %243 : vector<8x16xf32>
    %cst_87 = arith.constant dense<0.000000e+00> : vector<8xf32>
    %245 = vector.multi_reduction <add>, %244, %cst_87 [1] : vector<8x16xf32> to vector<8xf32>
    %246 = vector.shape_cast %245 : vector<8xf32> to vector<8x1xf32>
    %247 = vector.broadcast %246 : vector<8x1xf32> to vector<8x16xf32>
    %248 = arith.divf %244, %247 : vector<8x16xf32>
    %cst_88 = arith.constant dense<0.000000e+00> : vector<8x8xf32>
    %249 = tpu.matmul %248, %235, %cst_88 {dimension_numbers = #tpu.dot_dimension_numbers<[1], [0], [0], [1], [0, 0, 1, 1], [], []>} : vector<8x16xf32>, vector<16x8xf32>, vector<8x8xf32> -> vector<8x8xf32>
    %250 = vector.extract_strided_slice %211 {offsets = [8, 0], sizes = [8, 32], strides = [1, 1]} : vector<32x32xf32> to vector<8x32xf32>
    %cst_89 = arith.constant dense<0.000000e+00> : vector<8x32xf32>
    %251 = tpu.matmul %249, %250, %cst_89 {dimension_numbers = #tpu.dot_dimension_numbers<[1], [0], [0], [1], [0, 0, 1, 1], [], []>} : vector<8x8xf32>, vector<8x32xf32>, vector<8x32xf32> -> vector<8x32xf32>
    %252 = arith.addf %232, %251 : vector<8x32xf32>
    %253 = vector.extract_strided_slice %200 {offsets = [0, 16], sizes = [8, 8], strides = [1, 1]} : vector<8x32xf32> to vector<8x8xf32>
    %254 = vector.extract_strided_slice %205 {offsets = [0, 16], sizes = [16, 8], strides = [1, 1]} : vector<16x32xf32> to vector<16x8xf32>
    %255 = vector.extract_strided_slice %210 {offsets = [0, 16], sizes = [16, 8], strides = [1, 1]} : vector<16x32xf32> to vector<16x8xf32>
    %256 = tpu.transpose %254, [1, 0] : vector<16x8xf32> -> vector<8x16xf32>
    %cst_90 = arith.constant dense<0.000000e+00> : vector<8x16xf32>
    %257 = tpu.matmul %253, %256, %cst_90 {dimension_numbers = #tpu.dot_dimension_numbers<[1], [0], [0], [1], [0, 0, 1, 1], [], []>} : vector<8x8xf32>, vector<8x16xf32>, vector<8x16xf32> -> vector<8x16xf32>
    %cst_91 = arith.constant 0.353553385 : f32
    %258 = vector.broadcast %cst_91 : f32 to vector<8x16xf32>
    %259 = arith.mulf %257, %258 : vector<8x16xf32>
    %cst_92 = arith.constant dense<0xFF800000> : vector<8xf32>
    %260 = vector.multi_reduction <maximumf>, %259, %cst_92 [1] : vector<8x16xf32> to vector<8xf32>
    %261 = vector.shape_cast %260 : vector<8xf32> to vector<8x1xf32>
    %262 = vector.broadcast %261 : vector<8x1xf32> to vector<8x16xf32>
    %263 = arith.subf %259, %262 : vector<8x16xf32>
    %264 = math.exp %263 : vector<8x16xf32>
    %cst_93 = arith.constant dense<0.000000e+00> : vector<8xf32>
    %265 = vector.multi_reduction <add>, %264, %cst_93 [1] : vector<8x16xf32> to vector<8xf32>
    %266 = vector.shape_cast %265 : vector<8xf32> to vector<8x1xf32>
    %267 = vector.broadcast %266 : vector<8x1xf32> to vector<8x16xf32>
    %268 = arith.divf %264, %267 : vector<8x16xf32>
    %cst_94 = arith.constant dense<0.000000e+00> : vector<8x8xf32>
    %269 = tpu.matmul %268, %255, %cst_94 {dimension_numbers = #tpu.dot_dimension_numbers<[1], [0], [0], [1], [0, 0, 1, 1], [], []>} : vector<8x16xf32>, vector<16x8xf32>, vector<8x8xf32> -> vector<8x8xf32>
    %270 = vector.extract_strided_slice %211 {offsets = [16, 0], sizes = [8, 32], strides = [1, 1]} : vector<32x32xf32> to vector<8x32xf32>
    %cst_95 = arith.constant dense<0.000000e+00> : vector<8x32xf32>
    %271 = tpu.matmul %269, %270, %cst_95 {dimension_numbers = #tpu.dot_dimension_numbers<[1], [0], [0], [1], [0, 0, 1, 1], [], []>} : vector<8x8xf32>, vector<8x32xf32>, vector<8x32xf32> -> vector<8x32xf32>
    %272 = arith.addf %252, %271 : vector<8x32xf32>
    %273 = vector.extract_strided_slice %200 {offsets = [0, 24], sizes = [8, 8], strides = [1, 1]} : vector<8x32xf32> to vector<8x8xf32>
    %274 = vector.extract_strided_slice %205 {offsets = [0, 24], sizes = [16, 8], strides = [1, 1]} : vector<16x32xf32> to vector<16x8xf32>
    %275 = vector.extract_strided_slice %210 {offsets = [0, 24], sizes = [16, 8], strides = [1, 1]} : vector<16x32xf32> to vector<16x8xf32>
    %276 = tpu.transpose %274, [1, 0] : vector<16x8xf32> -> vector<8x16xf32>
    %cst_96 = arith.constant dense<0.000000e+00> : vector<8x16xf32>
    %277 = tpu.matmul %273, %276, %cst_96 {dimension_numbers = #tpu.dot_dimension_numbers<[1], [0], [0], [1], [0, 0, 1, 1], [], []>} : vector<8x8xf32>, vector<8x16xf32>, vector<8x16xf32> -> vector<8x16xf32>
    %cst_97 = arith.constant 0.353553385 : f32
    %278 = vector.broadcast %cst_97 : f32 to vector<8x16xf32>
    %279 = arith.mulf %277, %278 : vector<8x16xf32>
    %cst_98 = arith.constant dense<0xFF800000> : vector<8xf32>
    %280 = vector.multi_reduction <maximumf>, %279, %cst_98 [1] : vector<8x16xf32> to vector<8xf32>
    %281 = vector.shape_cast %280 : vector<8xf32> to vector<8x1xf32>
    %282 = vector.broadcast %281 : vector<8x1xf32> to vector<8x16xf32>
    %283 = arith.subf %279, %282 : vector<8x16xf32>
    %284 = math.exp %283 : vector<8x16xf32>
    %cst_99 = arith.constant dense<0.000000e+00> : vector<8xf32>
    %285 = vector.multi_reduction <add>, %284, %cst_99 [1] : vector<8x16xf32> to vector<8xf32>
    %286 = vector.shape_cast %285 : vector<8xf32> to vector<8x1xf32>
    %287 = vector.broadcast %286 : vector<8x1xf32> to vector<8x16xf32>
    %288 = arith.divf %284, %287 : vector<8x16xf32>
    %cst_100 = arith.constant dense<0.000000e+00> : vector<8x8xf32>
    %289 = tpu.matmul %288, %275, %cst_100 {dimension_numbers = #tpu.dot_dimension_numbers<[1], [0], [0], [1], [0, 0, 1, 1], [], []>} : vector<8x16xf32>, vector<16x8xf32>, vector<8x8xf32> -> vector<8x8xf32>
    %290 = vector.extract_strided_slice %211 {offsets = [24, 0], sizes = [8, 32], strides = [1, 1]} : vector<32x32xf32> to vector<8x32xf32>
    %cst_101 = arith.constant dense<0.000000e+00> : vector<8x32xf32>
    %291 = tpu.matmul %289, %290, %cst_101 {dimension_numbers = #tpu.dot_dimension_numbers<[1], [0], [0], [1], [0, 0, 1, 1], [], []>} : vector<8x8xf32>, vector<8x32xf32>, vector<8x32xf32> -> vector<8x32xf32>
    %292 = arith.addf %272, %291 : vector<8x32xf32>
    %293 = vector.extract_strided_slice %195 {offsets = [3, 0], sizes = [1, 32], strides = [1, 1]} : vector<4x32xf32> to vector<1x32xf32>
    %294 = vector.broadcast %293 : vector<1x32xf32> to vector<8x32xf32>
    %295 = arith.addf %292, %294 : vector<8x32xf32>
    %296 = arith.addf %3, %295 : vector<8x32xf32>
    %cst_102 = arith.constant dense<0.000000e+00> : vector<16xf32>
    %297 = vector.multi_reduction <add>, %150, %cst_102 [1] : vector<16x32xf32> to vector<16xf32>
    %298 = vector.shape_cast %297 : vector<16xf32> to vector<16x1xf32>
    %cst_103 = arith.constant 3.200000e+01 : f32
    %299 = vector.broadcast %cst_103 : f32 to vector<16x1xf32>
    %300 = arith.divf %298, %299 : vector<16x1xf32>
    %301 = vector.broadcast %300 : vector<16x1xf32> to vector<16x32xf32>
    %302 = arith.subf %150, %301 : vector<16x32xf32>
    %303 = arith.mulf %302, %302 : vector<16x32xf32>
    %cst_104 = arith.constant dense<0.000000e+00> : vector<16xf32>
    %304 = vector.multi_reduction <add>, %303, %cst_104 [1] : vector<16x32xf32> to vector<16xf32>
    %305 = vector.shape_cast %304 : vector<16xf32> to vector<16x1xf32>
    %cst_105 = arith.constant 3.200000e+01 : f32
    %306 = vector.broadcast %cst_105 : f32 to vector<16x1xf32>
    %307 = arith.divf %305, %306 : vector<16x1xf32>
    %cst_106 = arith.constant 9.99999974E-6 : f32
    %308 = vector.broadcast %cst_106 : f32 to vector<16x1xf32>
    %309 = arith.addf %307, %308 : vector<16x1xf32>
    %310 = math.rsqrt %309 : vector<16x1xf32>
    %311 = vector.broadcast %310 : vector<16x1xf32> to vector<16x32xf32>
    %312 = arith.mulf %302, %311 : vector<16x32xf32>
    %313 = vector.extract_strided_slice %4 {offsets = [8, 0], sizes = [1, 32], strides = [1, 1]} : vector<12x32xf32> to vector<1x32xf32>
    %314 = vector.broadcast %313 : vector<1x32xf32> to vector<16x32xf32>
    %315 = arith.mulf %312, %314 : vector<16x32xf32>
    %316 = vector.extract_strided_slice %4 {offsets = [9, 0], sizes = [1, 32], strides = [1, 1]} : vector<12x32xf32> to vector<1x32xf32>
    %317 = vector.broadcast %316 : vector<1x32xf32> to vector<16x32xf32>
    %318 = arith.addf %315, %317 : vector<16x32xf32>
    %c0_107 = arith.constant 0 : index
    %c0_108 = arith.constant 0 : index
    %319 = vector.load %arg14[%c0_107, %c0_108] : memref<32x128xf32, #tpu.memory_space<vmem>>, vector<32x128xf32>
    %cst_109 = arith.constant dense<0.000000e+00> : vector<16x128xf32>
    %320 = tpu.matmul %318, %319, %cst_109 {dimension_numbers = #tpu.dot_dimension_numbers<[1], [0], [0], [1], [0, 0, 1, 1], [], []>} : vector<16x32xf32>, vector<32x128xf32>, vector<16x128xf32> -> vector<16x128xf32>
    %c0_110 = arith.constant 0 : index
    %c0_111 = arith.constant 0 : index
    %321 = vector.load %arg15[%c0_110, %c0_111] : memref<1x128xf32, #tpu.memory_space<vmem>>, vector<1x128xf32>
    %322 = vector.broadcast %321 : vector<1x128xf32> to vector<16x128xf32>
    %323 = arith.addf %320, %322 : vector<16x128xf32>
    %cst_112 = arith.constant 5.000000e-01 : f32
    %324 = vector.broadcast %cst_112 : f32 to vector<16x128xf32>
    %325 = arith.mulf %324, %323 : vector<16x128xf32>
    %cst_113 = arith.constant 0.707106769 : f32
    %326 = vector.broadcast %cst_113 : f32 to vector<16x128xf32>
    %327 = arith.mulf %323, %326 : vector<16x128xf32>
    %328 = math.erf %327 : vector<16x128xf32>
    %cst_114 = arith.constant 1.000000e+00 : f32
    %329 = vector.broadcast %cst_114 : f32 to vector<16x128xf32>
    %330 = arith.addf %329, %328 : vector<16x128xf32>
    %331 = arith.mulf %325, %330 : vector<16x128xf32>
    %c0_115 = arith.constant 0 : index
    %c0_116 = arith.constant 0 : index
    %332 = vector.load %arg16[%c0_115, %c0_116] : memref<128x32xf32, #tpu.memory_space<vmem>>, vector<128x32xf32>
    %cst_117 = arith.constant dense<0.000000e+00> : vector<16x32xf32>
    %333 = tpu.matmul %331, %332, %cst_117 {dimension_numbers = #tpu.dot_dimension_numbers<[1], [0], [0], [1], [0, 0, 1, 1], [], []>} : vector<16x128xf32>, vector<128x32xf32>, vector<16x32xf32> -> vector<16x32xf32>
    %c0_118 = arith.constant 0 : index
    %c0_119 = arith.constant 0 : index
    %334 = vector.load %arg17[%c0_118, %c0_119] : memref<1x32xf32, #tpu.memory_space<vmem>>, vector<1x32xf32>
    %335 = vector.broadcast %334 : vector<1x32xf32> to vector<16x32xf32>
    %336 = arith.addf %333, %335 : vector<16x32xf32>
    %337 = arith.addf %150, %336 : vector<16x32xf32>
    %cst_120 = arith.constant dense<0.000000e+00> : vector<8xf32>
    %338 = vector.multi_reduction <add>, %296, %cst_120 [1] : vector<8x32xf32> to vector<8xf32>
    %339 = vector.shape_cast %338 : vector<8xf32> to vector<8x1xf32>
    %cst_121 = arith.constant 3.200000e+01 : f32
    %340 = vector.broadcast %cst_121 : f32 to vector<8x1xf32>
    %341 = arith.divf %339, %340 : vector<8x1xf32>
    %342 = vector.broadcast %341 : vector<8x1xf32> to vector<8x32xf32>
    %343 = arith.subf %296, %342 : vector<8x32xf32>
    %344 = arith.mulf %343, %343 : vector<8x32xf32>
    %cst_122 = arith.constant dense<0.000000e+00> : vector<8xf32>
    %345 = vector.multi_reduction <add>, %344, %cst_122 [1] : vector<8x32xf32> to vector<8xf32>
    %346 = vector.shape_cast %345 : vector<8xf32> to vector<8x1xf32>
    %cst_123 = arith.constant 3.200000e+01 : f32
    %347 = vector.broadcast %cst_123 : f32 to vector<8x1xf32>
    %348 = arith.divf %346, %347 : vector<8x1xf32>
    %cst_124 = arith.constant 9.99999974E-6 : f32
    %349 = vector.broadcast %cst_124 : f32 to vector<8x1xf32>
    %350 = arith.addf %348, %349 : vector<8x1xf32>
    %351 = math.rsqrt %350 : vector<8x1xf32>
    %352 = vector.broadcast %351 : vector<8x1xf32> to vector<8x32xf32>
    %353 = arith.mulf %343, %352 : vector<8x32xf32>
    %354 = vector.extract_strided_slice %4 {offsets = [10, 0], sizes = [1, 32], strides = [1, 1]} : vector<12x32xf32> to vector<1x32xf32>
    %355 = vector.broadcast %354 : vector<1x32xf32> to vector<8x32xf32>
    %356 = arith.mulf %353, %355 : vector<8x32xf32>
    %357 = vector.extract_strided_slice %4 {offsets = [11, 0], sizes = [1, 32], strides = [1, 1]} : vector<12x32xf32> to vector<1x32xf32>
    %358 = vector.broadcast %357 : vector<1x32xf32> to vector<8x32xf32>
    %359 = arith.addf %356, %358 : vector<8x32xf32>
    %c0_125 = arith.constant 0 : index
    %c0_126 = arith.constant 0 : index
    %360 = vector.load %arg18[%c0_125, %c0_126] : memref<32x128xf32, #tpu.memory_space<vmem>>, vector<32x128xf32>
    %cst_127 = arith.constant dense<0.000000e+00> : vector<8x128xf32>
    %361 = tpu.matmul %359, %360, %cst_127 {dimension_numbers = #tpu.dot_dimension_numbers<[1], [0], [0], [1], [0, 0, 1, 1], [], []>} : vector<8x32xf32>, vector<32x128xf32>, vector<8x128xf32> -> vector<8x128xf32>
    %c0_128 = arith.constant 0 : index
    %c0_129 = arith.constant 0 : index
    %362 = vector.load %arg19[%c0_128, %c0_129] : memref<1x128xf32, #tpu.memory_space<vmem>>, vector<1x128xf32>
    %363 = vector.broadcast %362 : vector<1x128xf32> to vector<8x128xf32>
    %364 = arith.addf %361, %363 : vector<8x128xf32>
    %cst_130 = arith.constant 5.000000e-01 : f32
    %365 = vector.broadcast %cst_130 : f32 to vector<8x128xf32>
    %366 = arith.mulf %365, %364 : vector<8x128xf32>
    %cst_131 = arith.constant 0.707106769 : f32
    %367 = vector.broadcast %cst_131 : f32 to vector<8x128xf32>
    %368 = arith.mulf %364, %367 : vector<8x128xf32>
    %369 = math.erf %368 : vector<8x128xf32>
    %cst_132 = arith.constant 1.000000e+00 : f32
    %370 = vector.broadcast %cst_132 : f32 to vector<8x128xf32>
    %371 = arith.addf %370, %369 : vector<8x128xf32>
    %372 = arith.mulf %366, %371 : vector<8x128xf32>
    %c0_133 = arith.constant 0 : index
    %c0_134 = arith.constant 0 : index
    %373 = vector.load %arg20[%c0_133, %c0_134] : memref<128x32xf32, #tpu.memory_space<vmem>>, vector<128x32xf32>
    %cst_135 = arith.constant dense<0.000000e+00> : vector<8x32xf32>
    %374 = tpu.matmul %372, %373, %cst_135 {dimension_numbers = #tpu.dot_dimension_numbers<[1], [0], [0], [1], [0, 0, 1, 1], [], []>} : vector<8x128xf32>, vector<128x32xf32>, vector<8x32xf32> -> vector<8x32xf32>
    %c0_136 = arith.constant 0 : index
    %c0_137 = arith.constant 0 : index
    %375 = vector.load %arg21[%c0_136, %c0_137] : memref<1x32xf32, #tpu.memory_space<vmem>>, vector<1x32xf32>
    %376 = vector.broadcast %375 : vector<1x32xf32> to vector<8x32xf32>
    %377 = arith.addf %374, %376 : vector<8x32xf32>
    %378 = arith.addf %296, %377 : vector<8x32xf32>
    %c0_138 = arith.constant 0 : index
    %c0_139 = arith.constant 0 : index
    %c0_140 = arith.constant 0 : index
    %379 = vector.load %arg22[%c0_138, %c0_139, %c0_140] : memref<1x16x32xf32, #tpu.memory_space<vmem>>, vector<1x16x32xf32>
    %380 = vector.shape_cast %379 : vector<1x16x32xf32> to vector<16x32xf32>
    %381 = vector.shape_cast %337 : vector<16x32xf32> to vector<1x16x32xf32>
    tpu.vector_store %arg22[%c0_138, %c0_139, %c0_140], %381 {strides = array<i32>} : memref<1x16x32xf32, #tpu.memory_space<vmem>>, vector<1x16x32xf32>,
    %c0_141 = arith.constant 0 : index
    %c0_142 = arith.constant 0 : index
    %c0_143 = arith.constant 0 : index
    %382 = vector.load %arg23[%c0_141, %c0_142, %c0_143] : memref<1x8x32xf32, #tpu.memory_space<vmem>>, vector<1x8x32xf32>
    %383 = vector.shape_cast %382 : vector<1x8x32xf32> to vector<8x32xf32>
    %384 = vector.shape_cast %378 : vector<8x32xf32> to vector<1x8x32xf32>
    tpu.vector_store %arg23[%c0_141, %c0_142, %c0_143], %384 {strides = array<i32>} : memref<1x8x32xf32, #tpu.memory_space<vmem>>, vector<1x8x32xf32>,
    return
  }
  func.func @transform_0(%arg0: i32) -> (i32, i32, i32) {
    %c0_i32 = arith.constant 0 : i32
    %c0_i32_0 = arith.constant 0 : i32
    %c0_i32_1 = arith.constant 0 : i32
    return %arg0, %c0_i32, %c0_i32_0 : i32, i32, i32
  }
  func.func @transform_1(%arg0: i32) -> (i32, i32, i32) {
    %c0_i32 = arith.constant 0 : i32
    %c0_i32_0 = arith.constant 0 : i32
    %c0_i32_1 = arith.constant 0 : i32
    return %arg0, %c0_i32, %c0_i32_0 : i32, i32, i32
  }
  func.func @transform_2(%arg0: i32) -> (i32, i32) {
    %c0_i32 = arith.constant 0 : i32
    %c0_i32_0 = arith.constant 0 : i32
    %c0_i32_1 = arith.constant 0 : i32
    return %c0_i32, %c0_i32_0 : i32, i32
  }
  func.func @transform_3(%arg0: i32) -> (i32, i32) {
    %c0_i32 = arith.constant 0 : i32
    %c0_i32_0 = arith.constant 0 : i32
    %c0_i32_1 = arith.constant 0 : i32
    return %c0_i32, %c0_i32_0 : i32, i32
  }
  func.func @transform_4(%arg0: i32) -> (i32, i32) {
    %c0_i32 = arith.constant 0 : i32
    %c0_i32_0 = arith.constant 0 : i32
    %c0_i32_1 = arith.constant 0 : i32
    return %c0_i32, %c0_i32_0 : i32, i32
  }
  func.func @transform_5(%arg0: i32) -> (i32, i32) {
    %c0_i32 = arith.constant 0 : i32
    %c0_i32_0 = arith.constant 0 : i32
    %c0_i32_1 = arith.constant 0 : i32
    return %c0_i32, %c0_i32_0 : i32, i32
  }
  func.func @transform_6(%arg0: i32) -> (i32, i32) {
    %c0_i32 = arith.constant 0 : i32
    %c0_i32_0 = arith.constant 0 : i32
    %c0_i32_1 = arith.constant 0 : i32
    return %c0_i32, %c0_i32_0 : i32, i32
  }
  func.func @transform_7(%arg0: i32) -> (i32, i32) {
    %c0_i32 = arith.constant 0 : i32
    %c0_i32_0 = arith.constant 0 : i32
    %c0_i32_1 = arith.constant 0 : i32
    return %c0_i32, %c0_i32_0 : i32, i32
  }
  func.func @transform_8(%arg0: i32) -> (i32, i32) {
    %c0_i32 = arith.constant 0 : i32
    %c0_i32_0 = arith.constant 0 : i32
    %c0_i32_1 = arith.constant 0 : i32
    return %c0_i32, %c0_i32_0 : i32, i32
  }
  func.func @transform_9(%arg0: i32) -> (i32, i32) {
    %c0_i32 = arith.constant 0 : i32
    %c0_i32_0 = arith.constant 0 : i32
    %c0_i32_1 = arith.constant 0 : i32
    return %c0_i32, %c0_i32_0 : i32, i32
  }
  func.func @transform_10(%arg0: i32) -> (i32, i32) {
    %c0_i32 = arith.constant 0 : i32
    %c0_i32_0 = arith.constant 0 : i32
    %c0_i32_1 = arith.constant 0 : i32
    return %c0_i32, %c0_i32_0 : i32, i32
  }
  func.func @transform_11(%arg0: i32) -> (i32, i32) {
    %c0_i32 = arith.constant 0 : i32
    %c0_i32_0 = arith.constant 0 : i32
    %c0_i32_1 = arith.constant 0 : i32
    return %c0_i32, %c0_i32_0 : i32, i32
  }
  func.func @transform_12(%arg0: i32) -> (i32, i32) {
    %c0_i32 = arith.constant 0 : i32
    %c0_i32_0 = arith.constant 0 : i32
    %c0_i32_1 = arith.constant 0 : i32
    return %c0_i32, %c0_i32_0 : i32, i32
  }
  func.func @transform_13(%arg0: i32) -> (i32, i32) {
    %c0_i32 = arith.constant 0 : i32
    %c0_i32_0 = arith.constant 0 : i32
    %c0_i32_1 = arith.constant 0 : i32
    return %c0_i32, %c0_i32_0 : i32, i32
  }
  func.func @transform_14(%arg0: i32) -> (i32, i32) {
    %c0_i32 = arith.constant 0 : i32
    %c0_i32_0 = arith.constant 0 : i32
    %c0_i32_1 = arith.constant 0 : i32
    return %c0_i32, %c0_i32_0 : i32, i32
  }
  func.func @transform_15(%arg0: i32) -> (i32, i32) {
    %c0_i32 = arith.constant 0 : i32
    %c0_i32_0 = arith.constant 0 : i32
    %c0_i32_1 = arith.constant 0 : i32
    return %c0_i32, %c0_i32_0 : i32, i32
  }
  func.func @transform_16(%arg0: i32) -> (i32, i32) {
    %c0_i32 = arith.constant 0 : i32
    %c0_i32_0 = arith.constant 0 : i32
    %c0_i32_1 = arith.constant 0 : i32
    return %c0_i32, %c0_i32_0 : i32, i32
  }
  func.func @transform_17(%arg0: i32) -> (i32, i32) {
    %c0_i32 = arith.constant 0 : i32
    %c0_i32_0 = arith.constant 0 : i32
    %c0_i32_1 = arith.constant 0 : i32
    return %c0_i32, %c0_i32_0 : i32, i32
  }
  func.func @transform_18(%arg0: i32) -> (i32, i32) {
    %c0_i32 = arith.constant 0 : i32
    %c0_i32_0 = arith.constant 0 : i32
    %c0_i32_1 = arith.constant 0 : i32
    return %c0_i32, %c0_i32_0 : i32, i32
  }
  func.func @transform_19(%arg0: i32) -> (i32, i32) {
    %c0_i32 = arith.constant 0 : i32
    %c0_i32_0 = arith.constant 0 : i32
    %c0_i32_1 = arith.constant 0 : i32
    return %c0_i32, %c0_i32_0 : i32, i32
  }
  func.func @transform_20(%arg0: i32) -> (i32, i32) {
    %c0_i32 = arith.constant 0 : i32
    %c0_i32_0 = arith.constant 0 : i32
    %c0_i32_1 = arith.constant 0 : i32
    return %c0_i32, %c0_i32_0 : i32, i32
  }
  func.func @transform_21(%arg0: i32) -> (i32, i32, i32) {
    %c0_i32 = arith.constant 0 : i32
    %c0_i32_0 = arith.constant 0 : i32
    %c0_i32_1 = arith.constant 0 : i32
    return %arg0, %c0_i32, %c0_i32_0 : i32, i32, i32
  }
  func.func @transform_22(%arg0: i32) -> (i32, i32, i32) {
    %c0_i32 = arith.constant 0 : i32
    %c0_i32_0 = arith.constant 0 : i32
    %c0_i32_1 = arith.constant 0 : i32
    return %arg0, %c0_i32, %c0_i32_0 : i32, i32, i32
  }
}

</mosaic_0001>

<bundles_post_ra>
// kernel: tpu_custom_call.1
= control target key start
LH: loop header
LB: loop body
LE: loop exit
PB: predicated region body
PF: predicated region fallthrough
CT: control target
= control target key end

     0   :  { %s6184_s0 = inlined_call_operand.vmem [shape: f32[2,16,32], index: 0, kind: input, shape index: {}]   ;;  %s6185_s1 = inlined_call_operand.hbm [shape: f32[2,8,32], index: 1, kind: input, shape index: {}]   ;;  %s6186_s2 = inlined_call_operand.hbm [shape: f32[12,32], index: 2, kind: input, shape index: {}]   ;;  %s6187_s3 = inlined_call_operand.vmem [shape: f32[32,32], index: 3, kind: input, shape index: {}]   ;;  %s6188_s4 = inlined_call_operand.vmem [shape: f32[32,32], index: 4, kind: input, shape index: {}]   ;;  %s6189_s5 = inlined_call_operand.vmem [shape: f32[32,32], index: 5, kind: input, shape index: {}]   ;;  %s6190_s6 = inlined_call_operand.vmem [shape: f32[32,32], index: 6, kind: input, shape index: {}]   ;;  %s6191_s7 = inlined_call_operand.vmem [shape: f32[4,32], index: 7, kind: input, shape index: {}]   ;;  %s6192_s8 = inlined_call_operand.vmem [shape: f32[32,32], index: 8, kind: input, shape index: {}]   ;;  %s6193_s9 = inlined_call_operand.vmem [shape: f32[32,32], index: 9, kind: input, shape index: {}]   ;;  %s6194_s10 = inlined_call_operand.vmem [shape: f32[32,32], index: 10, kind: input, shape index: {}]   ;;  %s6195_s11 = inlined_call_operand.vmem [shape: f32[32,32], index: 11, kind: input, shape index: {}]   ;;  %s6196_s12 = inlined_call_operand.vmem [shape: f32[4,32], index: 12, kind: input, shape index: {}]   ;;  %s6197_s13 = inlined_call_operand.hbm [shape: f32[32,128], index: 13, kind: input, shape index: {}]   ;;  %s6198_s14 = inlined_call_operand.vmem [shape: f32[1,128], index: 14, kind: input, shape index: {}]   ;;  %s6199_s15 = inlined_call_operand.vmem [shape: f32[128,32], index: 15, kind: input, shape index: {}]   ;;  %s6200_s16 = inlined_call_operand.vmem [shape: f32[1,32], index: 16, kind: input, shape index: {}]   ;;  %s6201_s17 = inlined_call_operand.hbm [shape: f32[32,128], index: 17, kind: input, shape index: {}]   ;;  %s6202_s18 = inlined_call_operand.vmem [shape: f32[1,128], index: 18, kind: input, shape index: {}]   ;;  %s6203_s19 = inlined_call_operand.vmem [shape: f32[128,32], index: 19, kind: input, shape index: {}]   ;;  %s6204_s20 = inlined_call_operand.vmem [shape: f32[1,32], index: 20, kind: input, shape index: {}]   ;;  %s6205_s21 = inlined_call_operand.hbm [shape: f32[2,16,32], index: 21, kind: output, shape index: {0}]   ;;  %s6206_s22 = inlined_call_operand.hbm [shape: f32[2,8,32], index: 22, kind: output, shape index: {1}]  }
   0x1   :  { %6232 = sst [smem:[#allocation20_spill]] %s6184_s0 }
   0x2   :  { %6233 = sst [smem:[#allocation21_spill]] %s6185_s1 }
   0x3   :  { %6234 = sst [smem:[#allocation22_spill]] %s6186_s2 }
   0x4   :  { %6235 = sst [smem:[#allocation23_spill]] %s6187_s3 }
   0x5   :  { %6236 = sst [smem:[#allocation24_spill]] %s6188_s4 }
   0x6   :  { %6237 = sst [smem:[#allocation25_spill]] %s6189_s5 }
   0x7   :  { %6238 = sst [smem:[#allocation26_spill]] %s6190_s6 }
   0x8   :  { %6239 = sst [smem:[#allocation27_spill]] %s6191_s7 }
   0x9   :  { %6240 = sst [smem:[#allocation28_spill]] %s6192_s8 }
   0xa   :  { %6241 = sst [smem:[#allocation29_spill]] %s6193_s9 }
   0xb   :  { %6242 = sst [smem:[#allocation30_spill]] %s6194_s10 }
   0xc   :  { %6243 = sst [smem:[#allocation31_spill]] %s6195_s11 }
   0xd   :  { %6244 = sst [smem:[#allocation32_spill]] %s6196_s12 }
   0xe   :  { %6245 = sst [smem:[#allocation33_spill]] %s6197_s13 }
   0xf   :  { %6246 = sst [smem:[#allocation34_spill]] %s6198_s14 }
  0x10   :  { %6247 = sst [smem:[#allocation35_spill]] %s6199_s15 }
  0x11   :  { %6248 = sst [smem:[#allocation36_spill]] %s6200_s16 }
  0x12   :  { %6249 = sst [smem:[#allocation37_spill]] %s6202_s18 }
  0x13   :  { %6250 = sst [smem:[#allocation38_spill]] %s6203_s19 }
  0x14   :  { %6251 = sst [smem:[#allocation39_spill]] %s6204_s20 }
  0x15   :  { %6252 = sst [smem:[#allocation40_spill]] %s6205_s21 }
  0x16   :  { %6253 = sst [smem:[#allocation41_spill]] %s6206_s22 }
  0x17   :  { %28 = vsyncpa [#allocation3], 0 }
  0x18   :  { %30 = vsyncpa [#allocation3 + $0x1], 0 }
  0x19   :  { %31 = vsyncpa [#allocation6], 0 }
  0x1a   :  { %32 = vsyncpa [#allocation9], 0 }
  0x1b   :  { %33 = vsyncpa [#allocation4], 0 }
  0x1c   :  { %35 = vsyncpa [#allocation4 + $0x1], 0 }
  0x1d   :  { %36 = vsyncpa [#allocation12], 0 }
  0x1e   :  { %38 = vsyncpa [#allocation12 + $0x1], 0  ;;  %s5319_s3 = smov 0   ;;  %s5321_s28 = smov 0  }
  0x1f   :  { %s5323_s29 = smov 0   ;;  %s5325_s30 = smov 0  }
  0x20 LB: > { %6254 = sst [smem:[#allocation18_spill]] %s5174_s3  ;;  %s5340_s4 = sadd.s32 4294967295, %s5186_s30   ;;  %s5186_s30 = sphi %s5325_s30, %s6306_s30   ;;  %s5182_s29 = sphi %s5323_s29, %s6305_s29   ;;  %s5178_s28 = sphi %s5321_s28, %s6304_s28   ;;  %s5174_s3 = sphi %s5319_s3, %s6303_s3  }
  0x21   : > { %s4100_s0 = sadd.s32 4294967294, %s5186_s30   ;;  %p90_p0 = scmp.ne.s32.totalorder %s5178_s28, %s5174_s3 }
  0x22   : > { %p6218_p1 = scmp.eq.s32.totalorder %s5340_s4, 0  ;;  %p519_p3 = scmp.eq.s32.totalorder %s4100_s0, 1 }
  0x23   : > { %p4101_p5 = scmp.ge.s32.totalorder %s5186_s30, 1  ;;  %p552_p7 = scmp.lt.s32.totalorder %s5186_s30, 3 }
  0x24   : > { %p5349_p4 = por %p6218_p1, %p90_p0  ;;  %p5354_p6 = por %p519_p3, %p90_p0 }
  0x25   : > { %p5359_p8 = pnand %p4101_p5, %p552_p7  ;;  %s5188_s24 = smov [#allocation5]  }
  0x26   : > { %s6255_s23 = scalar_select %p5349_p4, 1, 0 }
  0x27   : > { %s6256_s1 = scalar_select %p5354_p6, 1, 0 }
  0x28   : > { %s6258_s5 = scalar_select %p5359_p8, 1, 0 }
  0x29   : > { %6257 = sst [smem:[#allocation19_spill]] %s6256_s1  ;;  %s564_s6 = sshll.u32 %s5188_s24, 4  ;;  %s5363_s6 = int_to_ptr.vmem [resolvable:$true] %s564_s6 }
  0x2a   : > { %p4795_p9 = pneg %p5359_p8  ;;  %s5189_s26 = smov [#allocation7]  }
  0x2b   : > { %s607_s2 = sshll.u32 %s5189_s26, 4  ;;  %s5190_s27 = smov [#allocation8]   ;;  %s5374_s2 = int_to_ptr.vmem [resolvable:$true] %s607_s2 }
  0x2c   : > { %p5370_p11 = pnand %p4795_p9, %p6218_p1  ;;  %s5376_s0 = sshll.u32 %s5190_s27, 4  ;;  %s630_s0 = int_to_ptr.vmem [resolvable:$true] %s5376_s0 }
  0x2d   : > { %s6260_s3 = sld [smem:[#allocation22_spill]] }
  0x2e   : > { %p5386_p13 = pneg %p5370_p11 }
  0x33   : > { %s6261_s22 = smov %s6260_s3  ;;  %s4966_s20 = scalar_lea.hbm %s6260_s3, 256 }
  0x34   : > { %p4967_p12 = scmp.ne.s32.totalorder %s6261_s22, %s4966_s20  ;;  %p4973_p5 = scmp.lt.u32.totalorder %s4966_s20, %s6261_s22 }
  0x36   : > { %p4969_p0 = pnand %p5386_p13, %p4967_p12 }
  0x38   : > { %p4970_p3 = pneg %p4969_p0 }
  0x3a   : > { %p4975_p7 = pnand %p4973_p5, %p4970_p3 }
  0x3c   : > { %4978 = shalt.err (!%p4975_p7)
}
  0x3d   : > { %s4979_s18 = scalar_lea.vmem %s5363_s6, 256  ;;  %p4987_p2 = scmp.lt.s32.totalorder %s5363_s6, %s5363_s6 }
  0x3e   : > { %p4980_p9 = scmp.ne.s32.totalorder %s5363_s6, %s4979_s18  ;;  %p4988_p6 = scmp.lt.s32.totalorder %s4979_s18, %s4979_s18 }
  0x40   : > { %p4982_p10 = pnand %p4980_p9, %p5386_p13  ;;  %p4989_p12 = por %p4988_p6, %p4987_p2 }
  0x42   : > { %p4983_p1 = pneg %p4982_p10 }
  0x44   : > { %p4990_p0 = pnand %p4989_p12, %p4983_p1 }
  0x46   : > { %4993 = shalt.err (!%p4990_p0)
}
  0x47   : > { %s5191_s21 = smov 128   ;;  %s5192_s20 = smov 8  }
  0x48   : > { %4798 = dma.hbm_to_vmem [thread:$0]  (!%p5370_p11), %s6261_s22, 256, %s5363_s6, [#allocation6], %s5191_s21, %s5191_s21, %s5192_s20  }
  0x49   : > { %s6263_s13 = sld [smem:[#allocation33_spill]] }
  0x4f   : > { %s4994_s27 = scalar_lea.hbm %s6263_s13, 512 }
  0x50   : > { %p4995_p1 = scmp.ne.s32.totalorder %s6263_s13, %s4994_s27  ;;  %p5001_p10 = scmp.lt.u32.totalorder %s4994_s27, %s6263_s13 }
  0x52   : > { %p4997_p2 = pnand %p4995_p1, %p5386_p13 }
  0x54   : > { %p4998_p6 = pneg %p4997_p2 }
  0x56   : > { %p5003_p3 = pnand %p5001_p10, %p4998_p6 }
  0x58   : > { %5006 = shalt.err (!%p5003_p3)
}
  0x59   : > { %s5007_s6 = scalar_lea.vmem %s5374_s2, 512  ;;  %p5015_p12 = scmp.lt.s32.totalorder %s5374_s2, %s5374_s2 }
  0x5a   : > { %p5008_p5 = scmp.ne.s32.totalorder %s5374_s2, %s5007_s6  ;;  %p5016_p0 = scmp.lt.s32.totalorder %s5007_s6, %s5007_s6 }
  0x5c   : > { %p5010_p7 = pnand %p5008_p5, %p5386_p13  ;;  %p5017_p1 = por %p5016_p0, %p5015_p12 }
  0x5e   : > { %p5011_p9 = pneg %p5010_p7 }
  0x60   : > { %p5018_p2 = pnand %p5017_p1, %p5011_p9 }
  0x62   : > { %5021 = shalt.err (!%p5018_p2)
}
  0x63   : > { %4801 = dma.hbm_to_vmem [thread:$0]  (!%p5370_p11), %s6263_s13, 512, %s5374_s2, [#allocation6], %s5191_s21, %s5191_s21, %s5192_s20  }
  0x64   : > { %s5022_s1 = scalar_lea.hbm %s6201_s17, 512 }
  0x65   : > { %p5023_p6 = scmp.ne.s32.totalorder %s6201_s17, %s5022_s1  ;;  %p5029_p5 = scmp.lt.u32.totalorder %s5022_s1, %s6201_s17 }
  0x67   : > { %p5025_p10 = pnand %p5023_p6, %p5386_p13 }
  0x69   : > { %p5026_p3 = pneg %p5025_p10 }
  0x6b   : > { %p5031_p7 = pnand %p5029_p5, %p5026_p3 }
  0x6d   : > { %5034 = shalt.err (!%p5031_p7)
}
  0x6e   : > { %s5035_s6 = scalar_lea.vmem %s630_s0, 512  ;;  %p5043_p1 = scmp.lt.s32.totalorder %s630_s0, %s630_s0 }
  0x6f   : > { %p5036_p9 = scmp.ne.s32.totalorder %s630_s0, %s5035_s6  ;;  %p5044_p2 = scmp.lt.s32.totalorder %s5035_s6, %s5035_s6 }
  0x71   : > { %p5038_p12 = pnand %p5036_p9, %p5386_p13  ;;  %p5045_p4 = por %p5044_p2, %p5043_p1 }
  0x73   : > { %p5039_p0 = pneg %p5038_p12 }
  0x75   : > { %p5046_p8 = pnand %p5045_p4, %p5039_p0 }
  0x77   : > { %5049 = shalt.err (!%p5046_p8)
}
  0x78   : > { %4804 = dma.hbm_to_vmem [thread:$0]  (!%p5370_p11), %s6201_s17, 512, %s630_s0, [#allocation9], %s5191_s21, %s5191_s21, %s5192_s20  }
  0x79   : > { %s5459_s19 = sadd.s32 1, %s5186_s30   ;;  %s77_s15 = sadd.s32 1, %s5182_s29 }
  0x7a   : > { %s74_s25 = ssub.s32 %s5186_s30, %s5459_s19  ;;  %p84_p8 = scmp.ne.s32.totalorder %s5182_s29, %s5178_s28 }
  0x7b   : > { %p75_p4 = scmp.eq.s32.totalorder %s74_s25, 0  ;;  %p85_p13 = scmp.eq.s32.totalorder %s5186_s30, 0 }
  0x7c   : > { %p4819_p6 = scmp.lt.s32.totalorder %s5186_s30, 2  ;;  %p6264_p3 = scmp.eq.s32.totalorder %s5340_s4, 1 }
  0x7d   : > { %s5469_s16 = scalar_select %p75_p4, %s5182_s29, %s77_s15  }
  0x7e   : > { %p86_p10 = por %p85_p13, %p84_p8  ;;  %p5473_p5 = por %p6264_p3, %p84_p8 }
  0x7f   : > { %s660_s1 = sand.u32 1, %s5182_s29   ;;  %s4107_s24 = sshll.u32 %s5186_s30, 7 }
  0x80   : > { %s4106_s0 = sshll.u32 %s660_s1, 3  ;;  %s6266_s26 = sld [smem:[#allocation21_spill]] }
  0x81   : > { %s664_s18 = scalar_lea.vmem [#allocation2], %s4106_s0  ;;  %p5484_p11 = pnand %p4819_p6, %p86_p10 }
  0x82   : > { %s671_s6 = sshll.u32 %s664_s18, 4  ;;  %s661_s14 = scalar_lea.sflag [#allocation3], %s660_s1  ;;  %s5488_s6 = int_to_ptr.vmem [resolvable:$true] %s671_s6 }
  0x83   : > { %p5052_p9 = pneg %p5484_p11 }
  0x86   : > { %s5482_s27 = scalar_lea.hbm %s6266_s26, %s4107_s24  ;;  %s5055_s0 = scalar_lea.hbm %s6266_s26, 256 }
  0x87   : > { %s5050_s25 = scalar_lea.hbm %s5482_s27, 128  ;;  %p5056_p1 = scmp.lt.u32.totalorder %s5482_s27, %s6266_s26 }
  0x88   : > { %p5051_p7 = scmp.ne.s32.totalorder %s5482_s27, %s5050_s25  ;;  %p5057_p2 = scmp.lt.u32.totalorder %s5055_s0, %s5050_s25 }
  0x89   : > { %p5059_p8 = scmp.lt.u32.totalorder %s5050_s25, %s5482_s27 }
  0x8a   : > { %p5053_p12 = pnand %p5052_p9, %p5051_p7  ;;  %p5058_p4 = por %p5057_p2, %p5056_p1 }
  0x8c   : > { %p5054_p0 = pneg %p5053_p12  ;;  %p5060_p13 = por %p5059_p8, %p5058_p4 }
  0x8e   : > { %p5061_p6 = pnand %p5060_p13, %p5054_p0 }
  0x90   : > { %5064 = shalt.err (!%p5061_p6)
}
  0x91   : > { %s5065_s1 = scalar_lea.vmem %s5488_s6, 128  ;;  %s5193_s18 = smov [#allocation2]  }
  0x92   : > { %p5066_p10 = scmp.ne.s32.totalorder %s5488_s6, %s5065_s1  ;;  %s5070_s15 = sshll.u32 %s5193_s18, 4  ;;  %s5071_s15 = int_to_ptr.vmem [resolvable:$false] %s5070_s15 }
  0x93   : > { %s5072_s24 = scalar_lea.vmem %s5071_s15, 256  ;;  %p5073_p12 = scmp.lt.s32.totalorder %s5488_s6, %s5071_s15 }
  0x94   : > { %p5068_p3 = pnand %p5066_p10, %p5052_p9  ;;  %p5074_p1 = scmp.lt.s32.totalorder %s5072_s24, %s5065_s1 }
  0x96   : > { %p5069_p7 = pneg %p5068_p3  ;;  %p5075_p2 = por %p5074_p1, %p5073_p12 }
  0x98   : > { %p5076_p4 = pnand %p5075_p2, %p5069_p7 }
  0x9a   : > { %5079 = shalt.err (!%p5076_p4)
}
  0x9b   : > { %4808 = dma.hbm_to_vmem [thread:$0]  (!%p5484_p11), %s5482_s27, 128, %s5488_s6, %s661_s14  }
  0x9c   : > { %p6268_p0 = scmp.ne.s32.totalorder %s6258_s5, 0 }
  0x9d   : > { %s5518_s25 = sand.u32 (!%p6268_p0), 1, %s5178_s28   ;;  %p6269_p9 = scmp.ne.s32.totalorder (!%p6268_p0), %s6255_s23, 0 }
  0x9e   : > { %680 = sbr.rel (%p6268_p0) target bundleno = 6651 (0x19fb), region = 104  ;;  %s6222_s0 = sshll.u32 (!%p6268_p0), %s5518_s25, 3 }
  0x9f   : > { %s683_s21 = scalar_lea.sflag (!%p6268_p0), [#allocation3], %s5518_s25  ;;  %s5524_s20 = scalar_lea.vmem (!%p6268_p0), [#allocation2], %s6222_s0 }
  0xa5   : > { %5153 = dma.done.wait (%p6269_p9), %s683_s21, 128  }
  0xa6   : > { %5155 = vsyncadd (%p6269_p9), %s683_s21, 4294967168  ;;  %p6270_p11 = scmp.eq.s32.totalorder %s5340_s4, 0 }
  0xa8   : > { %5157 = dma.done.wait (%p6270_p11), [#allocation6], 768   ;;  %p6271_p8 = pmov %p6270_p11 }
  0xaa   : > { %5159 = vsyncadd (%p6271_p8), [#allocation6], 4294966528  ;;  %p6272_p13 = pmov %p6271_p8 }
  0xab   : > { %p6273_p6 = pmov %p6271_p8 }
  0xac   : > { %5161 = dma.done.wait (%p6272_p13), [#allocation9], 512  }
  0xad   : > { %5163 = vsyncadd (%p6273_p6), [#allocation9], 4294966784  ;;  %p769_p10 = scmp.lt.s32.totalorder %s5340_s4, 1  ;;  %s6274_s2 = sld [smem:[#allocation20_spill]]  ;;  %vm779_vm0 = vcmask 261120   ;;  %v776_v1 = vld [vmem:[%s5524_s20] sm:$0xff]  ;;  %v807_v37 = vlaneseq }
  0xae   : > { %v819_v4 = vsel %vm779_vm0, %v776_v1, 0.0  ;;  %s6275_s15 = sld [smem:[#allocation23_spill]]  ;;  %s6276_s23 = sld [smem:[#allocation25_spill]]  ;;  %v5194_v25 = vmov 0.0|0.0   ;;  %vm5195_vm1 = vmmov 0   ;;  %v5196_v34 = vmov 0.0  }
  0xaf   : > { %s770_s5 = scalar_select %p769_p10, %s5340_s4, 1  ;;  %820 = vadd.xlane.f32.xlu1 %v819_v4  ;;  %4645 = vmatprep.subr.bf16.mxu0 %v5194_v25  ;;  %v5595_v43 = vshrl.u32 %v807_v37, 7  ;;  %v5600_v47 = vld [vmem:[#allocation5] sm:$0xff]  ;;  %vm1095_vm2 = vcmask 64512   ;;  %vm2593_vm4 = vcmask 130048  }
  0xb0   : > { %4367 = vmatprep.mubr.msk.f32.mxu0 %vm5195_vm1, %v5196_v34  ;;  %s6278_s7 = sld [smem:[#allocation27_spill]]  ;;  %s6227_s6 = smov 120   ;;  %vm5847_vm3 = vmpackc.low %vm1095_vm2, %vm1095_vm2 }
  0xb1   : > { %s4188_s27 = sshll.u32 %s770_s5, 4  ;;  %v5598_v46 = vsub.s32 0, %v5595_v43  ;;  %v5603_v48 = vsub.s32 1, %v5595_v43  ;;  %v5608_v50 = vsub.s32 2, %v5595_v43  ;;  %v5613_v54 = vsub.s32 3, %v5595_v43  ;;  %s6279_s24 = sld [smem:[#allocation26_spill]] }
  0xb2   : > { %s6225_s5 = smov 104   ;;  %s6280_s8 = sld [smem:[#allocation28_spill]] }
  0xb3   : > { %s773_s14 = scalar_lea.vmem %s6274_s2, %s4188_s27  ;;  %v810_v49 = vrot.slane %v5600_v47, %v5598_v46  ;;  %v816_v53 = vrot.slane %v5600_v47, %v5603_v48  ;;  %v835_v56 = vrot.slane %v5600_v47, %v5608_v50  ;;  %v840_v61 = vrot.slane %v5600_v47, %v5613_v54  ;;  %s6277_s2 = sld [smem:[#allocation24_spill]] }
  0xb4   : > { %v5543_v0 = vld [vmem:[%s773_s14] sm:$0xff]  ;;  %v5546_v2 = vld [vmem:[%s773_s14 + $0x8] sm:$0xff]  ;;  %v845_v27 = vld [vmem:[%s6275_s15 + $0x10] sm:$0xff]  ;;  %s6223_s14 = smov 112   ;;  %s6281_s9 = sld [smem:[#allocation29_spill]] }
  0xb5   : > { %v780_v3 = vsel %vm779_vm0, %v5543_v0, 0.0  ;;  %v783_v5 = vsel %vm779_vm0, %v5546_v2, 0.0  ;;  %v843_v21 = vld [vmem:[%s6275_s15] sm:$0xff]  ;;  %v844_v22 = vld [vmem:[%s6275_s15 + $0x8] sm:$0xff]  ;;  %v846_v28 = vld [vmem:[%s6275_s15 + $0x18] sm:$0xff]  ;;  %s6282_s10 = sld [smem:[#allocation30_spill]] }
  0xb6   : > { %781 = vadd.xlane.f32.xlu0 %v780_v3  ;;  %v1013_v23 = vld [vmem:[%s6276_s23] sm:$0xff]  ;;  %v4631_v24 = vpack.c.bf16 %v844_v22, %v843_v21  ;;  %v1014_v26 = vld [vmem:[%s6276_s23 + $0x8] sm:$0xff]  ;;  %v4635_v30 = vpack.c.bf16 %v846_v28, %v845_v27  ;;  %v1015_v31 = vld [vmem:[%s6276_s23 + $0x10] sm:$0xff]  ;;  %s6283_s12 = sld [smem:[#allocation32_spill]]  ;;  %s6286_s18 = smov 120  }
  0xb7   : > { %v4646_v29 = vpack.c.bf16 %v1014_v26, %v1013_v23  ;;  %v1016_v32 = vld [vmem:[%s6276_s23 + $0x18] sm:$0xff]  ;;  %s6287_s11 = sld [smem:[#allocation31_spill]]  ;;  %s6288_s27 = smov 104  }
  0xb8   : > { %4632 = vmatprep.subr.bf16.mxu1 %v4631_v24  ;;  %v4649_v33 = vpack.c.bf16 %v1016_v32, %v1015_v31  ;;  %s6294_s1 = sld [smem:[#allocation37_spill]] }
  0xb9   : > { %4634 = vmatpush3.bf16.msra.mxu1 %v4631_v24  ;;  %4647 = vmatpush3.bf16.msra.mxu0 %v4646_v29  ;;  %v932_v63 = vld [vmem:[%s6277_s2] sm:$0xff] }
  0xba   : > { %784 = vadd.xlane.f32.xlu0 %v783_v5  ;;  %4636 = vmatprep.subr.bf16.mxu1 %v4635_v30 }
  0xbb   : > { %4648 = vmatprep.subr.bf16.mxu0 %v5194_v25 }
  0xbd   : > { %4638 = vmatpush3.bf16.msra.mxu1 %v4635_v30  ;;  %4650 = vmatpush3.bf16.msra.mxu0 %v4649_v33 }
  0xbe   : > { %4639 = vmatprep.subr.bf16.mxu1 %v5194_v25 }
 0x13c   : > { %v821_v7 = vpop.xlane.xlu1 %820 }
 0x13d   : > { %v822_v9 = vmul.f32 0.03125, %v821_v7 }
 0x13f   : > { %v5554_v11 = vsub.f32 %v776_v1, %v822_v9  ;;  %v933_v1 = vld [vmem:[%s6277_s2 + $0x8] sm:$0xff]  ;;  %v935_v9 = vld [vmem:[%s6277_s2 + $0x18] sm:$0xff] }
 0x140   : > { %v4640_v5 = vpack.c.bf16 %v933_v1, %v932_v63 }
 0x141   : > { %v824_v15 = vmul.f32 %v5554_v11, %v5554_v11 }
 0x143   : > { %v782_v6 = vpop.xlane.xlu0 %781  ;;  %v825_v18 = vsel %vm779_vm0, %v824_v15, 0.0 }
 0x144   : > { %v787_v8 = vmul.f32 0.03125, %v782_v6 }
 0x146   : > { %v789_v10 = vsub.f32 %v5543_v0, %v787_v8  ;;  %v934_v8 = vld [vmem:[%s6277_s2 + $0x10] sm:$0xff]  ;;  %s6293_s2 = sld [smem:[#allocation38_spill]] }
 0x147   : > { %v785_v12 = vpop.xlane.xlu0 %784 }
 0x148   : > { %v788_v13 = vmul.f32 0.03125, %v785_v12  ;;  %v791_v14 = vmul.f32 %v789_v10, %v789_v10 }
 0x14a   : > { %v5559_v16 = vsub.f32 %v5546_v2, %v788_v13  ;;  %v793_v17 = vsel %vm779_vm0, %v791_v14, 0.0 }
 0x14b   : > { %794 = vadd.xlane.f32.xlu1 %v793_v17 }
 0x14c   : > { %v792_v19 = vmul.f32 %v5559_v16, %v5559_v16 }
 0x14e   : > { %v796_v20 = vsel %vm779_vm0, %v792_v19, 0.0 }
 0x14f   : > { %826 = vadd.xlane.f32.xlu1 %v825_v18  ;;  %797 = vadd.xlane.f32.xlu0 %v796_v20 }
 0x1d8   : > { %v795_v35 = vpop.xlane.xlu1 %794 }
 0x1d9   : > { %v799_v36 = vmul.f32 0.03125, %v795_v35 }
 0x1db   : > { %v801_v38 = vadd.f32 1e-05, %v799_v36 }
 0x1dc   : > { %v827_v39 = vpop.xlane.xlu1 %826  ;;  %v798_v40 = vpop.xlane.xlu0 %797 }
 0x1dd   : > { %4899 = vrsqrt.f32 %v801_v38  ;;  %v828_v41 = vmul.f32 0.03125, %v827_v39  ;;  %v800_v42 = vmul.f32 0.03125, %v798_v40 }
 0x1df   : > { %v829_v44 = vadd.f32 1e-05, %v828_v41  ;;  %v802_v45 = vadd.f32 1e-05, %v800_v42 }
 0x1e1   : > { %4901 = vrsqrt.f32 %v829_v44 }
 0x1e2   : > { %4903 = vrsqrt.f32 %v802_v45 }
 0x1e7   : > { %v4900_v51 = vpop.eup %4899 }
 0x1e8   : > { %v805_v52 = vmul.f32 %v4900_v51, %v789_v10  ;;  %v4643_v10 = vpack.c.bf16 %v935_v9, %v934_v8 }
 0x1ea   : > { %v811_v55 = vmul.f32 %v810_v49, %v805_v52 }
 0x1eb   : > { %v4902_v57 = vpop.eup %4901 }
 0x1ec   : > { %v4904_v58 = vpop.eup %4903  ;;  %v817_v59 = vadd.f32 %v816_v53, %v811_v55  ;;  %v5618_v60 = vmul.f32 %v4902_v57, %v5554_v11  ;;  %v5646_v11 = vld [vmem:[%s6278_s7] sm:$0xf]  ;;  %s6291_s7 = sld [smem:[#allocation34_spill]] }
 0x1ed   : > { %v806_v62 = vmul.f32 %v4904_v58, %v5559_v16  ;;  %v850_v12 = vrot.slane %v5646_v11, %v5598_v46  ;;  %v939_v18 = vrot.slane %v5646_v11, %v5603_v48  ;;  %v1020_v20 = vrot.slane %v5646_v11, %v5608_v50 }
 0x1ee   : > { %4345 = vmatprep.mubr.msk.f32.mxu1 %vm779_vm0, %v817_v59  ;;  %v836_v3 = vmul.f32 %v835_v56, %v5618_v60 }
 0x1ef   : > { %v812_v4 = vmul.f32 %v810_v49, %v806_v62 }
 0x1f0   : > { %v841_v6 = vadd.f32 %v840_v61, %v836_v3 }
 0x1f1   : > { %v818_v7 = vadd.f32 %v816_v53, %v812_v4 }
 0x1f2   : > { %4368 = vmatmul.mubr.msk.f32.vlgmr.msra.gmra.mrb[0].mxu0 %vm779_vm0, %v841_v6 }
 0x1f3   : > { %4346 = vmatmul.mubr.msk.f32.vlgmr.msra.gmra.mrb[0].mxu1 %vm779_vm0, %v818_v7 }
 0x1f4   : > { %4641 = vmatpush3.bf16.msra.mxu1 %v4640_v5  ;;  %4356 = vmatprep.mubr.msk.f32.mxu1 %vm5195_vm1, %v5196_v34 }
 0x1f5   : > { %4642 = vmatprep.subr.bf16.mxu1 %v5194_v25 }
 0x1f8   : > { %4644 = vmatpush3.bf16.msra.mxu1 %v4643_v10 }
 0x1fb   : > { %4357 = vmatmul.mubr.msk.f32.vlgmr.msra.gmra.mrb[2].mxu1 %vm779_vm0, %v841_v6 }
 0x2c5   : > { %v1087_v13 = vpop.f32.mrb[0].mxu0 }
 0x2c6   : > { %v4347_v14 = vpop.f32.mrb[0].mxu1  ;;  %v4369_v15 = vpop.f32.mrb[1].mxu0  ;;  %v5666_v24 = vadd.f32 %v1087_v13, %v1020_v20 }
 0x2c7   : > { %v923_v16 = vpop.f32.mrb[1].mxu1  ;;  %v5658_v19 = vadd.f32 %v4347_v14, %v850_v12 }
 0x2c8   : > { %v5650_v17 = vadd.f32 %v923_v16, %v850_v12 }
 0x2ca   : > { %1285 = vrot.lane.b32.xlu1 %v5650_v17, %s6227_s6  ;;  %4372 = vmatprep.mubr.msk.f32.mxu1 %vm1095_vm2, %v5650_v17 }
 0x2ce   : > { %v1009_v21 = vpop.f32.mrb[2].mxu1  ;;  %1287 = vrot.lane.b32.xlu1 %v5658_v19, %s6227_s6 }
 0x2cf   : > { %v5664_v22 = vadd.f32 %v1009_v21, %v939_v18  ;;  %v4358_v23 = vpop.f32.mrb[3].mxu1 }
 0x2d1   : > { %1289 = vrot.lane.b32.xlu0 %v5664_v22, %s6227_s6  ;;  %4370 = vmatprep.subr.msk.mxu1 %vm1095_vm2, %v5664_v22 }
 0x2d2   : > { %4371 = vmatpush3.xpose.msk.msra.mxu1 %vm1095_vm2, %v5664_v22 }
 0x2d3   : > { %4375 = vmatprep.subr.mxu1 %v5666_v24 }
 0x2d5   : > { %4373 = vmatmul.mubr.msk.f32.vlgmr.msra.gmra.mrb[4].mxu1 %vm1095_vm2, %v5658_v19 }
 0x2d6   : > { %4376 = vmatpush3.msra.mxu1 %v5666_v24 }
 0x33c   : > { %v1286_v26 = vpop.permute.xlu1 %1285 }
 0x33d   : > { %4382 = vmatprep.mubr.msk.f32.mxu0 %vm1095_vm2, %v1286_v26 }
 0x340   : > { %v1288_v28 = vpop.permute.xlu1 %1287 }
 0x343   : > { %v1290_v27 = vpop.permute.xlu0 %1289 }
 0x344   : > { %4380 = vmatprep.subr.msk.mxu0 %vm1095_vm2, %v1290_v27 }
 0x345   : > { %4381 = vmatpush3.xpose.msk.msra.mxu0 %vm1095_vm2, %v1290_v27 }
 0x348   : > { %4383 = vmatmul.mubr.msk.f32.vlgmr.msra.gmra.mrb[2].mxu0 %vm1095_vm2, %v1288_v28 }
 0x3a8   : > { %v4374_v29 = vpop.f32.mrb[4].mxu1 }
 0x3a9   : > { %v1181_v30 = vmul.f32 0.35355338, %v4374_v29  ;;  %v1171_v31 = vpop.f32.mrb[5].mxu1  ;;  %v1092_v29 = vld [vmem:[%s6279_s24 + $0x8] sm:$0xff] }
 0x3aa   : > { %v1180_v32 = vmul.f32 0.35355338, %v1171_v31  ;;  %4390 = vmatprep.subr.mxu0 %v1092_v29 }
 0x3ab   : > { %v1185_v33 = vsel %vm1095_vm2, %v1181_v30, -inf  ;;  %4391 = vmatpush3.msra.mxu0 %v1092_v29 }
 0x3ac   : > { %1186 = vmax.xlane.f32.xlu0 %v1185_v33  ;;  %v1182_v35 = vsel %vm1095_vm2, %v1180_v32, -inf }
 0x3ad   : > { %1183 = vmax.xlane.f32.xlu1 %v1182_v35 }
 0x3be   : > { %1397 = vrot.lane.b32.xlu1 %v5666_v24, %s6227_s6 }
 0x41b   : > { %v4384_v36 = vpop.f32.mrb[2].mxu0 }
 0x41c   : > { %v1363_v37 = vpop.f32.mrb[3].mxu0  ;;  %v1373_v39 = vmul.f32 0.35355338, %v4384_v36 }
 0x41d   : > { %v1372_v38 = vmul.f32 0.35355338, %v1363_v37 }
 0x41e   : > { %v1377_v41 = vsel %vm1095_vm2, %v1373_v39, -inf }
 0x41f   : > { %v1374_v40 = vsel %vm1095_vm2, %v1372_v38, -inf }
 0x420   : > { %1375 = vmax.xlane.f32.xlu0 %v1374_v40 }
 0x424   : > { %1378 = vmax.xlane.f32.xlu0 %v1377_v41 }
 0x439   : > { %v1187_v42 = vpop.xlane.xlu0 %1186 }
 0x43a   : > { %v1189_v44 = vsub.f32 %v1181_v30, %v1187_v42  ;;  %v1184_v45 = vpop.xlane.xlu1 %1183  ;;  %v1091_v30 = vld [vmem:[%s6279_s24] sm:$0xff] }
 0x43b   : > { %v1188_v49 = vsub.f32 %v1180_v32, %v1184_v45  ;;  %4395 = vmatprep.subr.mxu0 %v1091_v30 }
 0x43c   : > { %v1192_v51 = vmul.f32 1.442695, %v1189_v44 }
 0x43d   : > { %v1190_v52 = vmul.f32 1.442695, %v1188_v49 }
 0x43e   : > { %4905 = vpow2.f32 %v1192_v51  ;;  %v1398_v53 = vpop.permute.xlu1 %1397 }
 0x43f   : > { %4907 = vpow2.f32 %v1190_v52  ;;  %4385 = vmatprep.subr.mxu1 %v1398_v53 }
 0x448   : > { %v4906_v55 = vpop.eup %4905 }
 0x449   : > { %v4908_v56 = vpop.eup %4907  ;;  %v1197_v57 = vsel %vm1095_vm2, %v4906_v55, 0.0 }
 0x44a   : > { %1198 = vadd.xlane.f32.xlu0 %v1197_v57  ;;  %v1194_v58 = vsel %vm1095_vm2, %v4908_v56, 0.0 }
 0x44b   : > { %1195 = vadd.xlane.f32.xlu1 %v1194_v58 }
 0x45c   : > { %1643 = vrot.lane.b32.xlu1 %v5650_v17, %s6223_s14 }
 0x4ad   : > { %v1376_v59 = vpop.xlane.xlu0 %1375 }
 0x4ae   : > { %v1380_v61 = vsub.f32 %v1372_v38, %v1376_v59 }
 0x4b0   : > { %v1382_v62 = vmul.f32 1.442695, %v1380_v61 }
 0x4b1   : > { %v1379_v63 = vpop.xlane.xlu0 %1378 }
 0x4b2   : > { %4909 = vpow2.f32 %v1382_v62  ;;  %v1381_v1 = vsub.f32 %v1373_v39, %v1379_v63 }
 0x4b4   : > { %v1384_v3 = vmul.f32 1.442695, %v1381_v1 }
 0x4b6   : > { %4911 = vpow2.f32 %v1384_v3  ;;  %v2209_v3 = vsub.s32 4, %v5595_v43 }
 0x4bc   : > { %v4910_v4 = vpop.eup %4909 }
 0x4bd   : > { %v1386_v5 = vsel %vm1095_vm2, %v4910_v4, 0.0 }
 0x4be   : > { %1387 = vadd.xlane.f32.xlu1 %v1386_v5  ;;  %v2256_v5 = vld [vmem:[%s6280_s8] sm:$0xff] }
 0x4c0   : > { %v4912_v6 = vpop.eup %4911 }
 0x4c1   : > { %v1389_v7 = vsel %vm1095_vm2, %v4912_v6, 0.0 }
 0x4c2   : > { %1390 = vadd.xlane.f32.xlu0 %v1389_v7  ;;  %v2210_v7 = vrot.slane %v5600_v47, %v2209_v3 }
 0x4cf   : > { %1645 = vrot.lane.b32.xlu1 %v5658_v19, %s6223_s14 }
 0x4d7   : > { %v1199_v8 = vpop.xlane.xlu0 %1198 }
 0x4d8   : > { %4913 = vrcp.f32 %v1199_v8  ;;  %1647 = vrot.lane.b32.xlu0 %v5664_v22, %s6223_s14  ;;  %v1196_v9 = vpop.xlane.xlu1 %1195  ;;  %v2258_v8 = vld [vmem:[%s6280_s8 + $0x10] sm:$0xff] }
 0x4d9   : > { %4915 = vrcp.f32 %v1196_v9  ;;  %v2259_v9 = vld [vmem:[%s6280_s8 + $0x18] sm:$0xff] }
 0x4dc   : > { %v1644_v15 = vpop.permute.xlu1 %1643 }
 0x4e2   : > { %v4914_v10 = vpop.eup %4913 }
 0x4e3   : > { %v4916_v12 = vpop.eup %4915  ;;  %v1203_v14 = vmul.f32 %v4914_v10, %v4906_v55  ;;  %v2214_v10 = vsub.s32 5, %v5595_v43 }
 0x4e4   : > { %v1201_v13 = vmul.f32 %v4916_v12, %v4908_v56 }
 0x4e6   : > { %4377 = vmatprep.mubr.msk.f32.mxu1 %vm1095_vm2, %v1201_v13  ;;  %v4655_v13 = vpack.c.bf16 %v2259_v9, %v2258_v8 }
 0x4e7   : > { %4378 = vmatmul.mubr.msk.f32.vlgmr.msra.gmra.mrb[6].mxu1 %vm1095_vm2, %v1203_v14  ;;  %v2211_v14 = vmul.f32 %v2210_v7, %v5618_v60 }
 0x4e8   : > { %4386 = vmatpush3.msra.mxu1 %v1398_v53 }
 0x54b   : > { %v1388_v16 = vpop.xlane.xlu1 %1387 }
 0x54c   : > { %4917 = vrcp.f32 %v1388_v16 }
 0x54f   : > { %v1391_v18 = vpop.xlane.xlu0 %1390  ;;  %v1646_v28 = vpop.permute.xlu1 %1645 }
 0x550   : > { %4919 = vrcp.f32 %v1391_v18  ;;  %v1093_v18 = vld [vmem:[%s6279_s24 + $0x10] sm:$0xff] }
 0x553   : > { %v1648_v20 = vpop.permute.xlu0 %1647 }
 0x554   : > { %4400 = vmatprep.subr.msk.mxu1 %vm1095_vm2, %v1648_v20 }
 0x556   : > { %v4918_v21 = vpop.eup %4917 }
 0x557   : > { %v1393_v23 = vmul.f32 %v4918_v21, %v4910_v4 }
 0x559   : > { %4387 = vmatprep.mubr.msk.f32.mxu1 %vm1095_vm2, %v1393_v23 }
 0x55a   : > { %v4920_v26 = vpop.eup %4919 }
 0x55b   : > { %v1395_v27 = vmul.f32 %v4920_v26, %v4912_v6 }
 0x55d   : > { %4388 = vmatmul.mubr.msk.f32.vlgmr.msra.gmra.mrb[8].mxu1 %vm1095_vm2, %v1395_v27 }
 0x55e   : > { %4401 = vmatpush3.xpose.msk.msra.mxu1 %vm1095_vm2, %v1648_v20  ;;  %4402 = vmatprep.mubr.msk.f32.mxu1 %vm1095_vm2, %v1644_v15  ;;  %v2215_v15 = vrot.slane %v5600_v47, %v2214_v10  ;;  %v2337_v10 = vld [vmem:[%s6281_s9] sm:$0xff] }
 0x560   : > { %v2216_v16 = vadd.f32 %v2215_v15, %v2211_v14  ;;  %v2427_v15 = vld [vmem:[%s6282_s10 + $0x8] sm:$0xff] }
 0x561   : > { %4403 = vmatmul.mubr.msk.f32.vlgmr.msra.gmra.mrb[10].mxu1 %vm1095_vm2, %v1646_v28 }
 0x5ba   : > { %v4379_v31 = vpop.f32.mrb[6].mxu1 }
 0x5bb   : > { %v1276_v32 = vpop.f32.mrb[7].mxu1 }
 0x630   : > { %v4389_v33 = vpop.f32.mrb[8].mxu1 }
 0x631   : > { %v1472_v35 = vpop.f32.mrb[9].mxu1 }
 0x632   : > { %4392 = vmatprep.mubr.msk.f32.mxu0 %vm1095_vm2, %v1472_v35 }
 0x633   : > { %4393 = vmatmul.mubr.msk.f32.vlgmr.msra.gmra.mrb[4].mxu0 %vm1095_vm2, %v4389_v33 }
 0x634   : > { %4397 = vmatprep.mubr.msk.f32.mxu0 %vm1095_vm2, %v1276_v32  ;;  %v4404_v36 = vpop.f32.mrb[10].mxu1  ;;  %4396 = vmatpush3.msra.mxu0 %v1091_v30 }
 0x635   : > { %v1731_v37 = vmul.f32 0.35355338, %v4404_v36  ;;  %v1721_v38 = vpop.f32.mrb[11].mxu1  ;;  %4410 = vmatprep.subr.mxu0 %v1093_v18 }
 0x636   : > { %v1730_v39 = vmul.f32 0.35355338, %v1721_v38 }
 0x637   : > { %v1735_v40 = vsel %vm1095_vm2, %v1731_v37, -inf }
 0x638   : > { %1736 = vmax.xlane.f32.xlu0 %v1735_v40  ;;  %v1732_v41 = vsel %vm1095_vm2, %v1730_v39, -inf }
 0x639   : > { %1733 = vmax.xlane.f32.xlu1 %v1732_v41 }
 0x63b   : > { %4398 = vmatmul.mubr.msk.f32.vlgmr.msra.gmra.mrb[4].mxu0 %vm1095_vm2, %v4379_v31 }
 0x63c   : > { %4411 = vmatpush3.msra.mxu0 %v1093_v18  ;;  %v2339_v18 = vld [vmem:[%s6281_s9 + $0x10] sm:$0xff] }
 0x64a   : > { %1754 = vrot.lane.b32.xlu1 %v5666_v24, %s6223_s14  ;;  %s6289_s14 = smov 112  }
 0x64e   : > { %1921 = vrot.lane.b32.xlu1 %v5650_v17, %s6225_s5 }
 0x652   : > { %1923 = vrot.lane.b32.xlu1 %v5658_v19, %s6225_s5 }
 0x6c5   : > { %v1737_v42 = vpop.xlane.xlu0 %1736 }
 0x6c6   : > { %v1739_v44 = vsub.f32 %v1731_v37, %v1737_v42  ;;  %v1734_v45 = vpop.xlane.xlu1 %1733 }
 0x6c7   : > { %v1738_v49 = vsub.f32 %v1730_v39, %v1734_v45 }
 0x6c8   : > { %v1742_v51 = vmul.f32 1.442695, %v1739_v44 }
 0x6c9   : > { %v1740_v52 = vmul.f32 1.442695, %v1738_v49 }
 0x6ca   : > { %4921 = vpow2.f32 %v1742_v51  ;;  %v1755_v53 = vpop.permute.xlu1 %1754 }
 0x6cb   : > { %4405 = vmatprep.subr.mxu1 %v1755_v53  ;;  %4923 = vpow2.f32 %v1740_v52 }
 0x6cc   : > { %4406 = vmatpush3.msra.mxu1 %v1755_v53 }
 0x6ce   : > { %v1922_v63 = vpop.permute.xlu1 %1921 }
 0x6d2   : > { %v1924_v12 = vpop.permute.xlu1 %1923 }
 0x6d4   : > { %v4922_v55 = vpop.eup %4921 }
 0x6d5   : > { %v1747_v56 = vsel %vm1095_vm2, %v4922_v55, 0.0  ;;  %v4924_v57 = vpop.eup %4923 }
 0x6d6   : > { %1748 = vadd.xlane.f32.xlu0 %v1747_v56  ;;  %v1744_v17 = vsel %vm1095_vm2, %v4924_v57, 0.0 }
 0x6da   : > { %1745 = vadd.xlane.f32.xlu0 %v1744_v17  ;;  %v2202_v17 = vrot.slane %v5646_v11, %v5613_v54 }
 0x6f0   : > { %1925 = vrot.lane.b32.xlu0 %v5664_v22, %s6225_s5  ;;  %v2257_v22 = vld [vmem:[%s6280_s8 + $0x8] sm:$0xff] }
 0x6f1   : > { %v4652_v6 = vpack.c.bf16 %v2257_v22, %v2256_v5 }
 0x763   : > { %v1749_v19 = vpop.xlane.xlu0 %1748 }
 0x764   : > { %4925 = vrcp.f32 %v1749_v19 }
 0x767   : > { %v1746_v58 = vpop.xlane.xlu0 %1745 }
 0x768   : > { %4927 = vrcp.f32 %v1746_v58 }
 0x76b   : > { %v1926_v59 = vpop.permute.xlu0 %1925 }
 0x76c   : > { %4415 = vmatprep.subr.msk.mxu1 %vm1095_vm2, %v1926_v59 }
 0x76e   : > { %v4926_v61 = vpop.eup %4925 }
 0x76f   : > { %v1753_v4 = vmul.f32 %v4926_v61, %v4922_v55 }
 0x772   : > { %v4928_v62 = vpop.eup %4927 }
 0x773   : > { %v1751_v1 = vmul.f32 %v4928_v62, %v4924_v57 }
 0x775   : > { %4407 = vmatprep.mubr.msk.f32.mxu1 %vm1095_vm2, %v1751_v1 }
 0x776   : > { %4408 = vmatmul.mubr.msk.f32.vlgmr.msra.gmra.mrb[12].mxu1 %vm1095_vm2, %v1753_v4 }
 0x777   : > { %4416 = vmatpush3.xpose.msk.msra.mxu1 %vm1095_vm2, %v1926_v59  ;;  %4417 = vmatprep.mubr.msk.f32.mxu1 %vm1095_vm2, %v1922_v63 }
 0x778   : > { %4651 = vmatprep.subr.bf16.mxu1 %v5194_v25 }
 0x77a   : > { %4418 = vmatmul.mubr.msk.f32.vlgmr.msra.gmra.mrb[14].mxu1 %vm1095_vm2, %v1924_v12  ;;  %v2338_v12 = vld [vmem:[%s6281_s9 + $0x8] sm:$0xff] }
 0x77b   : > { %4653 = vmatpush3.bf16.msra.mxu1 %v4652_v6  ;;  %4438 = vmatprep.mubr.msk.f32.mxu1 %vm5195_vm1, %v5196_v34  ;;  %v4657_v14 = vpack.c.bf16 %v2338_v12, %v2337_v10 }
 0x77c   : > { %4654 = vmatprep.subr.bf16.mxu1 %v5194_v25 }
 0x77f   : > { %4656 = vmatpush3.bf16.msra.mxu1 %v4655_v13  ;;  %v2426_v13 = vld [vmem:[%s6282_s10] sm:$0xff] }
 0x782   : > { %4439 = vmatmul.mubr.msk.f32.vlgmr.msra.gmra.mrb[16].mxu1 %vm779_vm0, %v2216_v16  ;;  %v4665_v16 = vpack.c.bf16 %v2427_v15, %v2426_v13 }
 0x784   : > { %4666 = vmatprep.subr.bf16.mxu1 %v4665_v16 }
 0x785   : > { %4668 = vmatpush3.bf16.msra.mxu1 %v4665_v16 }
 0x849   : > { %v4409_v20 = vpop.f32.mrb[12].mxu1 }
 0x84a   : > { %v1829_v21 = vpop.f32.mrb[13].mxu1 }
 0x84b   : > { %4412 = vmatprep.mubr.msk.f32.mxu0 %vm1095_vm2, %v1829_v21  ;;  %v2428_v21 = vld [vmem:[%s6282_s10 + $0x10] sm:$0xff] }
 0x84c   : > { %4413 = vmatmul.mubr.msk.f32.vlgmr.msra.gmra.mrb[4].mxu0 %vm1095_vm2, %v4409_v20  ;;  %v2340_v20 = vld [vmem:[%s6281_s9 + $0x18] sm:$0xff] }
 0x84d   : > { %v4419_v60 = vpop.f32.mrb[14].mxu1 }
 0x84e   : > { %v2009_v23 = vmul.f32 0.35355338, %v4419_v60  ;;  %v1999_v26 = vpop.f32.mrb[15].mxu1  ;;  %v4661_v60 = vpack.c.bf16 %v2340_v20, %v2339_v18 }
 0x84f   : > { %v2008_v27 = vmul.f32 0.35355338, %v1999_v26 }
 0x850   : > { %v2013_v28 = vsel %vm1095_vm2, %v2009_v23, -inf }
 0x851   : > { %2014 = vmax.xlane.f32.xlu0 %v2013_v28  ;;  %v2010_v29 = vsel %vm1095_vm2, %v2008_v27, -inf }
 0x852   : > { %2011 = vmax.xlane.f32.xlu1 %v2010_v29 }
 0x855   : > { %v5763_v30 = vpop.f32.mrb[16].mxu1 }
 0x856   : > { %v4440_v31 = vpop.f32.mrb[17].mxu1 }
 0x863   : > { %2032 = vrot.lane.b32.xlu1 %v5666_v24, %s6225_s5  ;;  %v1094_v24 = vld [vmem:[%s6279_s24 + $0x18] sm:$0xff]  ;;  %s3923_s5 = scalar_lea.sflag [#allocation4], %s5518_s25 }
 0x8de   : > { %v2015_v32 = vpop.xlane.xlu0 %2014 }
 0x8df   : > { %v2017_v33 = vsub.f32 %v2009_v23, %v2015_v32  ;;  %v2012_v35 = vpop.xlane.xlu1 %2011  ;;  %v2429_v23 = vld [vmem:[%s6282_s10 + $0x18] sm:$0xff] }
 0x8e0   : > { %v2016_v36 = vsub.f32 %v2008_v27, %v2012_v35  ;;  %v4669_v26 = vpack.c.bf16 %v2429_v23, %v2428_v21  ;;  %v2245_v35 = vsub.s32 6, %v5595_v43 }
 0x8e1   : > { %v2020_v37 = vmul.f32 1.442695, %v2017_v33 }
 0x8e2   : > { %v2018_v38 = vmul.f32 1.442695, %v2016_v36  ;;  %4670 = vmatprep.subr.bf16.mxu1 %v4669_v26  ;;  %v2251_v36 = vsub.s32 7, %v5595_v43 }
 0x8e3   : > { %v2033_v39 = vpop.permute.xlu1 %2032  ;;  %4672 = vmatpush3.bf16.msra.mxu1 %v4669_v26 }
 0x8e4   : > { %4929 = vpow2.f32 %v2018_v38  ;;  %4420 = vmatprep.subr.mxu0 %v2033_v39  ;;  %4677 = vmatprep.subr.bf16.mxu1 %v5194_v25 }
 0x8e5   : > { %4421 = vmatpush3.msra.mxu0 %v2033_v39  ;;  %4931 = vpow2.f32 %v2020_v37  ;;  %v2246_v37 = vrot.slane %v5600_v47, %v2245_v35 }
 0x8e6   : > { %4425 = vmatprep.subr.mxu0 %v1094_v24 }
 0x8ee   : > { %v4930_v40 = vpop.eup %4929 }
 0x8ef   : > { %v2022_v41 = vsel %vm1095_vm2, %v4930_v40, 0.0  ;;  %v4932_v42 = vpop.eup %4931 }
 0x8f0   : > { %2023 = vadd.xlane.f32.xlu0 %v2022_v41  ;;  %v2025_v44 = vsel %vm1095_vm2, %v4932_v42, 0.0 }
 0x8f4   : > { %2026 = vadd.xlane.f32.xlu0 %v2025_v44 }
 0x97d   : > { %v2024_v45 = vpop.xlane.xlu0 %2023 }
 0x97e   : > { %4933 = vrcp.f32 %v2024_v45 }
 0x981   : > { %v2027_v49 = vpop.xlane.xlu0 %2026 }
 0x982   : > { %4935 = vrcp.f32 %v2027_v49 }
 0x988   : > { %v4934_v51 = vpop.eup %4933 }
 0x989   : > { %v2029_v52 = vmul.f32 %v4934_v51, %v4930_v40  ;;  %v2252_v40 = vrot.slane %v5600_v47, %v2251_v36  ;;  %v5839_v47 = vld [vmem:[%s6283_s12] sm:$0xf] }
 0x98a   : > { %v2344_v49 = vrot.slane %v5839_v47, %v5603_v48  ;;  %v2433_v51 = vrot.slane %v5839_v47, %v5608_v50 }
 0x98b   : > { %4422 = vmatprep.mubr.msk.f32.mxu0 %vm1095_vm2, %v2029_v52 }
 0x98c   : > { %v4936_v53 = vpop.eup %4935 }
 0x98d   : > { %v2031_v55 = vmul.f32 %v4936_v53, %v4932_v42 }
 0x98f   : > { %4423 = vmatmul.mubr.msk.f32.vlgmr.msra.gmra.mrb[6].mxu0 %vm1095_vm2, %v2031_v55 }
 0x990   : > { %4426 = vmatpush3.msra.mxu0 %v1094_v24 }
 0x991   : > { %4658 = vmatprep.subr.bf16.mxu0 %v4657_v14 }
 0xa62   : > { %v4424_v56 = vpop.f32.mrb[6].mxu0 }
 0xa63   : > { %v2107_v57 = vpop.f32.mrb[7].mxu0 }
 0xa64   : > { %4427 = vmatprep.mubr.msk.f32.mxu0 %vm1095_vm2, %v2107_v57 }
 0xa65   : > { %4428 = vmatmul.mubr.msk.f32.vlgmr.msra.gmra.mrb[4].mxu0 %vm1095_vm2, %v4424_v56 }
 0xa66   : > { %4660 = vmatpush3.bf16.msra.mxu0 %v4657_v14 }
 0xa67   : > { %4662 = vmatprep.subr.bf16.mxu0 %v4661_v60 }
 0xa6a   : > { %4664 = vmatpush3.bf16.msra.mxu0 %v4661_v60  ;;  %v2509_v60 = vld [vmem:[%s6287_s11] sm:$0xff] }
 0xa6b   : > { %4673 = vmatprep.subr.bf16.mxu0 %v5194_v25 }
 0xb38   : > { %v4429_v19 = vpop.f32.mrb[4].mxu0 }
 0xb39   : > { %v2188_v58 = vpop.f32.mrb[5].mxu0  ;;  %v2204_v59 = vadd.f32 %v4429_v19, %v2202_v17 }
 0xb3a   : > { %v2203_v61 = vadd.f32 %v2202_v17, %v2188_v58 }
 0xb3b   : > { %v5782_v63 = vadd.f32 %v2204_v59, %v5546_v2 }
 0xb3c   : > { %v5779_v62 = vadd.f32 %v2203_v61, %v5543_v0 }
 0xb3d   : > { %v2220_v3 = vsel %vm779_vm0, %v5782_v63, 0.0 }
 0xb3e   : > { %v2217_v1 = vsel %vm779_vm0, %v5779_v62, 0.0 }
 0xb3f   : > { %2218 = vadd.xlane.f32.xlu0 %v2217_v1 }
 0xb43   : > { %2221 = vadd.xlane.f32.xlu0 %v2220_v3 }
 0xbcc   : > { %v2219_v4 = vpop.xlane.xlu0 %2218 }
 0xbcd   : > { %v2223_v11 = vmul.f32 0.03125, %v2219_v4 }
 0xbcf   : > { %v2225_v5 = vsub.f32 %v5779_v62, %v2223_v11  ;;  %v2263_v11 = vrot.slane %v5839_v47, %v5598_v46 }
 0xbd0   : > { %v2222_v22 = vpop.xlane.xlu0 %2221 }
 0xbd1   : > { %v2224_v6 = vmul.f32 0.03125, %v2222_v22  ;;  %v2227_v7 = vmul.f32 %v2225_v5, %v2225_v5 }
 0xbd3   : > { %v2226_v0 = vsub.f32 %v5782_v63, %v2224_v6  ;;  %v2229_v2 = vsel %vm779_vm0, %v2227_v7, 0.0 }
 0xbd4   : > { %2230 = vadd.xlane.f32.xlu0 %v2229_v2 }
 0xbd5   : > { %v2228_v8 = vmul.f32 %v2226_v0, %v2226_v0 }
 0xbd7   : > { %v2232_v9 = vsel %vm779_vm0, %v2228_v8, 0.0 }
 0xbd8   : > { %2233 = vadd.xlane.f32.xlu0 %v2232_v9 }
 0xc61   : > { %v2231_v27 = vpop.xlane.xlu0 %2230 }
 0xc62   : > { %v2235_v28 = vmul.f32 0.03125, %v2231_v27 }
 0xc64   : > { %v2237_v29 = vadd.f32 1e-05, %v2235_v28 }
 0xc65   : > { %v2234_v31 = vpop.xlane.xlu0 %2233 }
 0xc66   : > { %4937 = vrsqrt.f32 %v2237_v29  ;;  %v2236_v32 = vmul.f32 0.03125, %v2234_v31 }
 0xc68   : > { %v2238_v33 = vadd.f32 1e-05, %v2236_v32 }
 0xc6a   : > { %4939 = vrsqrt.f32 %v2238_v33 }
 0xc70   : > { %v4938_v38 = vpop.eup %4937 }
 0xc71   : > { %v5821_v39 = vmul.f32 %v4938_v38, %v2225_v5  ;;  %v2334_v5 = vadd.f32 %v5763_v30, %v2263_v11  ;;  %v3512_v11 = vld [vmem:[#allocation7 + $0x8] sm:$0xff] }
 0xc73   : > { %v2247_v41 = vmul.f32 %v2246_v37, %v5821_v39 }
 0xc74   : > { %v4940_v42 = vpop.eup %4939 }
 0xc75   : > { %v5825_v44 = vmul.f32 %v4940_v42, %v2226_v0  ;;  %v2253_v24 = vadd.f32 %v2252_v40, %v2247_v41 }
 0xc77   : > { %v2248_v45 = vmul.f32 %v2246_v37, %v5825_v44  ;;  %4449 = vmatprep.mubr.msk.f32.mxu0 %vm779_vm0, %v2253_v24  ;;  %4460 = vmatprep.mubr.msk.f32.mxu1 %vm779_vm0, %v2253_v24 }
 0xc79   : > { %v2254_v43 = vadd.f32 %v2252_v40, %v2248_v45 }
 0xc7b   : > { %4450 = vmatmul.mubr.msk.f32.vlgmr.msra.gmra.mrb[8].mxu0 %vm779_vm0, %v2254_v43  ;;  %4461 = vmatmul.mubr.msk.f32.vlgmr.msra.gmra.mrb[18].mxu1 %vm779_vm0, %v2254_v43 }
 0xc7c   : > { %4467 = vmatprep.mubr.msk.f32.mxu0 %vm5195_vm1, %v5196_v34  ;;  %4474 = vmatprep.mubr.msk.f32.mxu1 %vm5195_vm1, %v5196_v34 }
 0xd4e   : > { %v4451_v52 = vpop.f32.mrb[8].mxu0  ;;  %v4462_v53 = vpop.f32.mrb[18].mxu1 }
 0xd4f   : > { %v2423_v55 = vadd.f32 %v4451_v52, %v2344_v49  ;;  %v2506_v56 = vadd.f32 %v4462_v53, %v2433_v51  ;;  %v2417_v57 = vpop.f32.mrb[9].mxu0  ;;  %v2500_v17 = vpop.f32.mrb[19].mxu1  ;;  %v2510_v52 = vld [vmem:[%s6287_s11 + $0x8] sm:$0xff] }
 0xd50   : > { %v2418_v19 = vadd.f32 %v2417_v57, %v2344_v49  ;;  %v2501_v58 = vadd.f32 %v2500_v17, %v2433_v51 }
 0xd52   : > { %v4674_v61 = vpack.c.bf16 %v2423_v55, %v2418_v19  ;;  %v4678_v1 = vpack.c.bf16 %v2506_v56, %v2501_v58  ;;  %v4869_v3 = vpack.i.bf16 %v2423_v55, %v2418_v19  ;;  %v5851_v4 = vpack.i.bf16 %v2506_v56, %v2501_v58 }
 0xd54   : > { %4676 = vmatpush3.bf16.xpose.msk.msra.mxu0 %vm5847_vm3, %v4674_v61  ;;  %4679 = vmatpush3.bf16.msra.mxu1 %v4678_v1 }
 0xd55   : > { %4680 = vmatprep.subr.bf16.mxu1 %v5194_v25  ;;  %4684 = vmatprep.subr.bf16.mxu0 %v5194_v25 }
 0xd5b   : > { %4468 = vmatmul.mubr.msk.f32.vlgmr.msra.gmra.mrb[10].mxu0 %vm1095_vm2, %v2334_v5 }
 0xd5c   : > { %4488 = vmatprep.mubr.msk.f32.mxu0 %vm5195_vm1, %v5196_v34 }
 0xe2e   : > { %v2588_v22 = vpop.f32.mrb[10].mxu0 }
 0xe2f   : > { %v2592_v6 = vmul.f32 0.35355338, %v2588_v22  ;;  %v4469_v7 = vpop.f32.mrb[11].mxu0 }
 0xe31   : > { %v2594_v0 = vsel %vm2593_vm4, %v2592_v6, -inf }
 0xe32   : > { %2595 = vmax.xlane.f32.xlu1 %v2594_v0 }
 0xebf   : > { %v2596_v2 = vpop.xlane.xlu1 %2595 }
 0xec0   : > { %v2597_v8 = vsub.f32 %v2592_v6, %v2596_v2 }
 0xec2   : > { %v2598_v9 = vmul.f32 1.442695, %v2597_v8 }
 0xec4   : > { %4941 = vpow2.f32 %v2598_v9  ;;  %v3513_v9 = vld [vmem:[#allocation7 + $0x10] sm:$0xff] }
 0xece   : > { %v4942_v10 = vpop.eup %4941 }
 0xecf   : > { %v2600_v12 = vsel %vm2593_vm4, %v4942_v10, 0.0 }
 0xed0   : > { %2601 = vadd.xlane.f32.xlu0 %v2600_v12 }
 0xee6   : > { %4870 = vrot.lane.b32.xlu0 %v4869_v3, %s6286_s18 }
 0xeea   : > { %2678 = vrot.lane.b32.xlu0 %v2334_v5, %s6286_s18 }
 0xf5d   : > { %v2602_v30 = vpop.xlane.xlu0 %2601 }
 0xf5e   : > { %4943 = vrcp.f32 %v2602_v30 }
 0xf61   : > { %v4871_v13 = vpop.permute.xlu0 %4870 }
 0xf62   : > { %v4873_v14 = vunpack.i.h.bf16 %v4871_v13  ;;  %v4872_v15 = vunpack.i.l.bf16 %v4871_v13 }
 0xf64   : > { %v4681_v20 = vpack.c.bf16 %v4873_v14, %v4872_v15 }
 0xf65   : > { %v2679_v21 = vpop.permute.xlu0 %2678 }
 0xf68   : > { %v4944_v16 = vpop.eup %4943 }
 0xf69   : > { %v2604_v18 = vmul.f32 %v4944_v16, %v4942_v10  ;;  %v3514_v10 = vld [vmem:[#allocation7 + $0x18] sm:$0xff] }
 0xf6a   : > { %v4705_v12 = vpack.c.bf16 %v3514_v10, %v3513_v9 }
 0xf6b   : > { %4475 = vmatmul.mubr.msk.f32.vlgmr.msra.gmra.mrb[20].mxu1 %vm2593_vm4, %v2604_v18 }
 0xf6c   : > { %4683 = vmatpush3.bf16.xpose.msk.msra.mxu1 %vm5847_vm3, %v4681_v20  ;;  %4481 = vmatprep.mubr.msk.f32.mxu1 %vm5195_vm1, %v5196_v34 }
 0xf6d   : > { %4496 = vmatprep.subr.mxu1 %v5196_v34 }
 0xf73   : > { %4482 = vmatmul.mubr.msk.f32.vlgmr.msra.gmra.mrb[22].mxu1 %vm1095_vm2, %v2679_v21 }
 0xf74   : > { %4498 = vmatprep.mubr.msk.f32.mxu1 %vm5195_vm1, %v5196_v34  ;;  %4497 = vmatpush3.msra.mxu1 %v2509_v60 }
 0xf75   : > { %4691 = vmatprep.subr.bf16.mxu1 %v5194_v25 }
0x103e   : > { %v2674_v23 = vpop.f32.mrb[20].mxu1 }
0x103f   : > { %v4476_v26 = vpop.f32.mrb[21].mxu1  ;;  %4499 = vmatmul.mubr.msk.f32.vlgmr.msra.gmra.mrb[24].mxu1 %vm1095_vm2, %v2674_v23 }
0x1040   : > { %4512 = vmatprep.mubr.msk.f32.mxu1 %vm5195_vm1, %v5196_v34 }
0x1046   : > { %v2756_v27 = vpop.f32.mrb[22].mxu1 }
0x1047   : > { %v2760_v28 = vmul.f32 0.35355338, %v2756_v27  ;;  %v4483_v29 = vpop.f32.mrb[23].mxu1 }
0x1049   : > { %v2761_v31 = vsel %vm2593_vm4, %v2760_v28, -inf }
0x104a   : > { %2762 = vmax.xlane.f32.xlu0 %v2761_v31 }
0x1060   : > { %4885 = vrot.lane.b32.xlu0 %v4869_v3, %s6288_s27 }
0x10d7   : > { %v2763_v32 = vpop.xlane.xlu0 %2762 }
0x10d8   : > { %v2764_v33 = vsub.f32 %v2760_v28, %v2763_v32 }
0x10da   : > { %v2765_v35 = vmul.f32 1.442695, %v2764_v33 }
0x10db   : > { %v4886_v19 = vpop.permute.xlu0 %4885 }
0x10dc   : > { %4945 = vpow2.f32 %v2765_v35  ;;  %v4888_v61 = vunpack.i.h.bf16 %v4886_v19  ;;  %v4887_v1 = vunpack.i.l.bf16 %v4886_v19 }
0x10de   : > { %v4695_v6 = vpack.c.bf16 %v4888_v61, %v4887_v1  ;;  %v2512_v1 = vld [vmem:[%s6287_s11 + $0x18] sm:$0xff] }
0x10e6   : > { %v4946_v36 = vpop.eup %4945 }
0x10e7   : > { %v2767_v37 = vsel %vm2593_vm4, %v4946_v36, 0.0 }
0x10e8   : > { %2768 = vadd.xlane.f32.xlu1 %v2767_v37 }
0x10f9   : > { %4875 = vrot.lane.b32.xlu1 %v5851_v4, %s6286_s18  ;;  %s4189_s18 = sshll.u32 %s5340_s4, 8 }
0x10fd   : > { %4880 = vrot.lane.b32.xlu1 %v4869_v3, %s6289_s14  ;;  %v3511_v3 = vld [vmem:[#allocation7] sm:$0xff] }
0x10fe   : > { %v4701_v22 = vpack.c.bf16 %v3512_v11, %v3511_v3 }
0x1101   : > { %2999 = vrot.lane.b32.xlu1 %v2334_v5, %s6289_s14 }
0x1105   : > { %3246 = vrot.lane.b32.xlu1 %v2334_v5, %s6288_s27  ;;  %v5905_v5 = vld [vmem:[#allocation5 + $0x8] sm:$0xf] }
0x1106   : > { %v3502_v0 = vrot.slane %v5905_v5, %v5598_v46  ;;  %v3508_v8 = vrot.slane %v5905_v5, %v5603_v48 }
0x1108   : > { %v3503_v2 = vmul.f32 %v3502_v0, %v5821_v39  ;;  %v3504_v46 = vmul.f32 %v3502_v0, %v5825_v44 }
0x110a   : > { %v3509_v13 = vadd.f32 %v3508_v8, %v3503_v2  ;;  %v3510_v59 = vadd.f32 %v3508_v8, %v3504_v46 }
0x1112   : > { %v2995_v38 = vpop.f32.mrb[24].mxu1 }
0x1113   : > { %v4500_v40 = vpop.f32.mrb[25].mxu1 }
0x1175   : > { %v2769_v41 = vpop.xlane.xlu1 %2768 }
0x1176   : > { %4947 = vrcp.f32 %v2769_v41 }
0x1179   : > { %v4876_v42 = vpop.permute.xlu1 %4875 }
0x117a   : > { %v4878_v24 = vunpack.i.h.bf16 %v4876_v42  ;;  %v4877_v45 = vunpack.i.l.bf16 %v4876_v42 }
0x117c   : > { %v4685_v43 = vpack.c.bf16 %v4878_v24, %v4877_v45 }
0x117d   : > { %v4881_v53 = vpop.permute.xlu1 %4880 }
0x117e   : > { %4686 = vmatpush3.bf16.msra.mxu0 %v4685_v43  ;;  %v4883_v55 = vunpack.i.h.bf16 %v4881_v53  ;;  %v4882_v56 = vunpack.i.l.bf16 %v4881_v53 }
0x117f   : > { %4491 = vmatprep.subr.mxu0 %v5196_v34 }
0x1180   : > { %v4948_v49 = vpop.eup %4947  ;;  %v4688_v57 = vpack.c.bf16 %v4883_v55, %v4882_v56 }
0x1181   : > { %v2771_v51 = vmul.f32 %v4948_v49, %v4946_v36  ;;  %v3000_v7 = vpop.permute.xlu1 %2999 }
0x1183   : > { %4489 = vmatmul.mubr.msk.f32.vlgmr.msra.gmra.mrb[12].mxu0 %vm2593_vm4, %v2771_v51  ;;  %v2511_v51 = vld [vmem:[%s6287_s11 + $0x10] sm:$0xff] }
0x1184   : > { %4492 = vmatpush3.msra.mxu0 %v2510_v52  ;;  %4493 = vmatprep.mubr.msk.f32.mxu0 %vm5195_vm1, %v5196_v34 }
0x1185   : > { %4687 = vmatprep.subr.bf16.mxu0 %v5194_v25  ;;  %v3247_v30 = vpop.permute.xlu1 %3246 }
0x1256   : > { %v2849_v17 = vpop.f32.mrb[12].mxu0 }
0x1257   : > { %v4490_v58 = vpop.f32.mrb[13].mxu0  ;;  %4494 = vmatmul.mubr.msk.f32.vlgmr.msra.gmra.mrb[14].mxu0 %vm1095_vm2, %v2849_v17 }
0x1258   : > { %4690 = vmatpush3.bf16.xpose.msk.msra.mxu0 %vm5847_vm3, %v4688_v57  ;;  %4505 = vmatprep.mubr.msk.f32.mxu0 %vm5195_vm1, %v5196_v34 }
0x1259   : > { %4694 = vmatprep.subr.bf16.mxu0 %v5194_v25 }
0x125f   : > { %4506 = vmatmul.mubr.msk.f32.vlgmr.msra.gmra.mrb[16].mxu0 %vm1095_vm2, %v3000_v7 }
0x1260   : > { %4697 = vmatpush3.bf16.xpose.msk.msra.mxu0 %vm5847_vm3, %v4695_v6  ;;  %4524 = vmatprep.mubr.msk.f32.mxu0 %vm5195_vm1, %v5196_v34  ;;  %v4174_v6 = vld [vmem:[%s6291_s7] ss:$0 sm:$0xff]  ;;  %s4113_s7 = sshll.u32 %s5518_s25, 4 }
0x1261   : > { %4702 = vmatprep.subr.bf16.mxu0 %v4701_v22 }
0x1267   : > { %4525 = vmatmul.mubr.msk.f32.vlgmr.msra.gmra.mrb[18].mxu0 %vm1095_vm2, %v3247_v30 }
0x1268   : > { %4704 = vmatpush3.bf16.msra.mxu0 %v4701_v22  ;;  %4547 = vmatprep.mubr.msk.f32.mxu0 %vm779_vm0, %v3509_v13 }
0x1269   : > { %4706 = vmatprep.subr.bf16.mxu0 %v4705_v12 }
0x126c   : > { %4708 = vmatpush3.bf16.msra.mxu0 %v4705_v12 }
0x126d   : > { %4741 = vmatprep.subr.bf16.mxu0 %v5194_v25 }
0x126f   : > { %4548 = vmatmul.mubr.msk.f32.vlgmr.msra.gmra.mrb[20].mxu0 %vm779_vm0, %v3510_v59 }
0x1270   : > { %4593 = vmatprep.mubr.msk.f32.mxu0 %vm5195_vm1, %v5196_v34 }
0x132a   : > { %v2922_v48 = vpop.f32.mrb[14].mxu0 }
0x132b   : > { %v5924_v39 = vadd.f32 %v2995_v38, %v2922_v48  ;;  %v4495_v14 = vpop.f32.mrb[15].mxu0 }
0x1332   : > { %v3077_v15 = vpop.f32.mrb[16].mxu0 }
0x1333   : > { %v3081_v16 = vmul.f32 0.35355338, %v3077_v15  ;;  %v4507_v18 = vpop.f32.mrb[17].mxu0 }
0x1335   : > { %v3082_v20 = vsel %vm2593_vm4, %v3081_v16, -inf }
0x1336   : > { %3083 = vmax.xlane.f32.xlu1 %v3082_v20 }
0x133a   : > { %v3324_v44 = vpop.f32.mrb[18].mxu0 }
0x133b   : > { %v4526_v21 = vpop.f32.mrb[19].mxu0  ;;  %v3328_v36 = vmul.f32 0.35355338, %v3324_v44 }
0x133d   : > { %v3329_v38 = vsel %vm2593_vm4, %v3328_v36, -inf }
0x1342   : > { %v5927_v60 = vpop.f32.mrb[20].mxu0 }
0x1343   : > { %v3594_v23 = vpop.f32.mrb[21].mxu0  ;;  %v3600_v21 = vadd.f32 %v5927_v60, %v4174_v6 }
0x1344   : > { %v3595_v7 = vadd.f32 %v4174_v6, %v3594_v23 }
0x1346   : > { %v3605_v0 = vmul.f32 0.70710677, %v3595_v7  ;;  %v3603_v46 = vmul.f32 0.5, %v3595_v7 }
0x1347   : > { %4890 = vrot.lane.b32.xlu1 %v5851_v4, %s6289_s14  ;;  %s6290_s14 = sld [smem:[#allocation35_spill]] }
0x134b   : > { %4895 = vrot.lane.b32.xlu1 %v5851_v4, %s6288_s27  ;;  %s6292_s27 = sld [smem:[#allocation36_spill]] }
0x134d   : > { %v3613_v3 = vld [vmem:[%s6290_s14] sm:$0xff]  ;;  %v3614_v11 = vld [vmem:[%s6290_s14 + $0x8] sm:$0xff]  ;;  %v3615_v10 = vld [vmem:[%s6290_s14 + $0x10] sm:$0xff] }
0x134e   : > { %v4709_v22 = vpack.c.bf16 %v3614_v11, %v3613_v3  ;;  %v3616_v12 = vld [vmem:[%s6290_s14 + $0x18] sm:$0xff]  ;;  %v3617_v15 = vld [vmem:[%s6290_s14 + $0x20] sm:$0xff]  ;;  %v3619_v20 = vld [vmem:[%s6290_s14 + $0x30] sm:$0xff] }
0x134f   : > { %v4713_v59 = vpack.c.bf16 %v3616_v12, %v3615_v10  ;;  %v3620_v44 = vld [vmem:[%s6290_s14 + $0x38] sm:$0xff] }
0x1350   : > { %v4721_v23 = vpack.c.bf16 %v3620_v44, %v3619_v20  ;;  %v3624_v60 = vld [vmem:[%s6290_s14 + $0x58] sm:$0xff]  ;;  %v3830_v44 = vld [vmem:[%s6293_s2 + $0x28] sm:$0xff] }
0x1351   : > { %v3828_v20 = vld [vmem:[%s6293_s2 + $0x18] sm:$0xff] }
0x13c3   : > { %v3084_v26 = vpop.xlane.xlu1 %3083 }
0x13c4   : > { %v3085_v27 = vsub.f32 %v3081_v16, %v3084_v26  ;;  %v3618_v16 = vld [vmem:[%s6290_s14 + $0x28] sm:$0xff]  ;;  %v3621_v26 = vld [vmem:[%s6290_s14 + $0x40] sm:$0xff] }
0x13c6   : > { %v3086_v28 = vmul.f32 1.442695, %v3085_v27  ;;  %v3622_v27 = vld [vmem:[%s6290_s14 + $0x48] sm:$0xff] }
0x13c7   : > { %v4891_v29 = vpop.permute.xlu1 %4890 }
0x13c8   : > { %4949 = vpow2.f32 %v3086_v28  ;;  %v4893_v31 = vunpack.i.h.bf16 %v4891_v29  ;;  %v4892_v32 = vunpack.i.l.bf16 %v4891_v29  ;;  %v3606_v28 = vmul.f32 0.70710677, %v3600_v21 }
0x13c9   : > { %v4725_v29 = vpack.c.bf16 %v3622_v27, %v3621_v26  ;;  %v3833_v27 = vld [vmem:[%s6293_s2 + $0x40] sm:$0xff] }
0x13ca   : > { %v4692_v33 = vpack.c.bf16 %v4893_v31, %v4892_v32  ;;  %v3623_v31 = vld [vmem:[%s6290_s14 + $0x50] sm:$0xff] }
0x13cb   : > { %v4896_v53 = vpop.permute.xlu1 %4895  ;;  %v4729_v32 = vpack.c.bf16 %v3624_v60, %v3623_v31  ;;  %v3835_v31 = vld [vmem:[%s6293_s2 + $0x50] sm:$0xff]  ;;  %v3836_v60 = vld [vmem:[%s6293_s2 + $0x58] sm:$0xff] }
0x13cc   : > { %4693 = vmatpush3.bf16.msra.mxu1 %v4692_v33  ;;  %v4898_v55 = vunpack.i.h.bf16 %v4896_v53  ;;  %v4897_v56 = vunpack.i.l.bf16 %v4896_v53  ;;  %v3625_v33 = vld [vmem:[%s6290_s14 + $0x60] sm:$0xff] }
0x13cd   : > { %4515 = vmatprep.subr.mxu1 %v5196_v34  ;;  %v4965_v53 = vld [vmem:[%s5524_s20] sm:$0xff]  ;;  %s6021_s20 = scalar_lea.vmem [#allocation10], %s4113_s7 }
0x13ce   : > { %v4699_v17 = vpack.c.bf16 %v4898_v55, %v4897_v56  ;;  %s3941_s6 = sshll.u32 %s6021_s20, 4  ;;  %s6103_s6 = int_to_ptr.vmem [resolvable:$true] %s3941_s6 }
0x13d2   : > { %v4950_v35 = vpop.eup %4949 }
0x13d3   : > { %v3088_v37 = vsel %vm2593_vm4, %v4950_v35, 0.0 }
0x13d4   : > { %3089 = vadd.xlane.f32.xlu0 %v3088_v37  ;;  %v3627_v37 = vld [vmem:[%s6290_s14 + $0x70] sm:$0xff] }
0x13d8   : > { %3330 = vmax.xlane.f32.xlu0 %v3329_v38  ;;  %v3628_v38 = vld [vmem:[%s6290_s14 + $0x78] sm:$0xff] }
0x1461   : > { %v3090_v4 = vpop.xlane.xlu0 %3089 }
0x1462   : > { %4951 = vrcp.f32 %v3090_v4  ;;  %v4737_v4 = vpack.c.bf16 %v3628_v38, %v3627_v37  ;;  %v3839_v37 = vld [vmem:[%s6293_s2 + $0x70] sm:$0xff]  ;;  %v3840_v38 = vld [vmem:[%s6293_s2 + $0x78] sm:$0xff] }
0x1465   : > { %v3331_v40 = vpop.xlane.xlu0 %3330 }
0x1466   : > { %v3332_v41 = vsub.f32 %v3328_v36, %v3331_v40 }
0x1468   : > { %v3333_v42 = vmul.f32 1.442695, %v3332_v41 }
0x146a   : > { %4953 = vpow2.f32 %v3333_v42  ;;  %v3604_v42 = vmul.f32 0.5, %v3600_v21 }
0x146c   : > { %v4952_v24 = vpop.eup %4951 }
0x146d   : > { %v3092_v45 = vmul.f32 %v4952_v24, %v4950_v35  ;;  %v3626_v35 = vld [vmem:[%s6290_s14 + $0x68] sm:$0xff] }
0x146e   : > { %v4733_v36 = vpack.c.bf16 %v3626_v35, %v3625_v33  ;;  %v3837_v33 = vld [vmem:[%s6293_s2 + $0x60] sm:$0xff]  ;;  %v3838_v35 = vld [vmem:[%s6293_s2 + $0x68] sm:$0xff] }
0x146f   : > { %4513 = vmatmul.mubr.msk.f32.vlgmr.msra.gmra.mrb[26].mxu1 %vm2593_vm4, %v3092_v45  ;;  %v3496_v45 = vrot.slane %v5839_v47, %v5613_v54 }
0x1470   : > { %4517 = vmatprep.mubr.msk.f32.mxu1 %vm5195_vm1, %v5196_v34  ;;  %4516 = vmatpush3.msra.mxu1 %v2511_v51 }
0x1471   : > { %4698 = vmatprep.subr.bf16.mxu1 %v5194_v25 }
0x1474   : > { %v4954_v43 = vpop.eup %4953 }
0x1475   : > { %v3335_v49 = vsel %vm2593_vm4, %v4954_v43, 0.0 }
0x1476   : > { %3336 = vadd.xlane.f32.xlu0 %v3335_v49 }
0x1503   : > { %v3337_v52 = vpop.xlane.xlu0 %3336 }
0x1504   : > { %4955 = vrcp.f32 %v3337_v52 }
0x1505   : > { %4957 = verf.f32 %v3605_v0  ;;  %v3736_v0 = vld [vmem:[#allocation8] sm:$0xff] }
0x1506   : > { %4959 = verf.f32 %v3606_v28  ;;  %v3834_v28 = vld [vmem:[%s6293_s2 + $0x48] sm:$0xff] }
0x150e   : > { %v4956_v57 = vpop.eup %4955 }
0x150f   : > { %v3339_v61 = vmul.f32 %v4956_v57, %v4954_v43  ;;  %v4958_v2 = vpop.eup %4957  ;;  %v4177_v57 = vld [vmem:[%s6292_s27] ss:$0 sm:$0xff]  ;;  %s6295_s27 = sld [smem:[#allocation40_spill]] }
0x1510   : > { %v3609_v8 = vadd.f32 1.0, %v4958_v2  ;;  %v4960_v40 = vpop.eup %4959 }
0x1511   : > { %v3610_v41 = vadd.f32 1.0, %v4960_v40  ;;  %v4178_v40 = vld [vmem:[%s6294_s1] ss:$0 sm:$0xff]  ;;  %s5080_s1 = scalar_lea.vmem %s6103_s6, 256 }
0x1512   : > { %v3611_v14 = vmul.f32 %v3609_v8, %v3603_v46  ;;  %v3739_v8 = vld [vmem:[#allocation8 + $0x18] sm:$0xff]  ;;  %p5081_p3 = scmp.ne.s32.totalorder %s6103_s6, %s5080_s1 }
0x1513   : > { %v3612_v24 = vmul.f32 %v3610_v41, %v3604_v42 }
0x1514   : > { %p5082_p7 = pnand %p5081_p3, %p5473_p5 }
0x1515   : > { %s6100_s7 = scalar_lea.hbm %s6295_s27, %s4189_s18 }
0x1516   : > { %p5083_p12 = pneg %p5082_p7 }
0x1542   : > { %v3168_v19 = vpop.f32.mrb[26].mxu1 }
0x1543   : > { %v4514_v58 = vpop.f32.mrb[27].mxu1  ;;  %4518 = vmatmul.mubr.msk.f32.vlgmr.msra.gmra.mrb[28].mxu1 %vm1095_vm2, %v3168_v19 }
0x1544   : > { %4700 = vmatpush3.bf16.msra.mxu1 %v4699_v17  ;;  %4531 = vmatprep.mubr.msk.f32.mxu1 %vm5195_vm1, %v5196_v34 }
0x1545   : > { %4534 = vmatprep.subr.mxu1 %v5196_v34 }
0x1547   : > { %4532 = vmatmul.mubr.msk.f32.vlgmr.msra.gmra.mrb[30].mxu1 %vm2593_vm4, %v3339_v61 }
0x1548   : > { %4536 = vmatprep.mubr.msk.f32.mxu1 %vm5195_vm1, %v5196_v34  ;;  %4535 = vmatpush3.msra.mxu1 %v2512_v1 }
0x1549   : > { %4710 = vmatprep.subr.bf16.mxu1 %v4709_v22 }
0x1616   : > { %v3241_v9 = vpop.f32.mrb[28].mxu1 }
0x1617   : > { %v3245_v30 = vadd.f32 %v3241_v9, %v5924_v39  ;;  %v4519_v13 = vpop.f32.mrb[29].mxu1  ;;  %v4717_v39 = vpack.c.bf16 %v3618_v16, %v3617_v15  ;;  %v3826_v15 = vld [vmem:[%s6293_s2 + $0x8] sm:$0xff] }
0x1618   : > { %v3729_v13 = vrot.slane %v5905_v5, %v5608_v50  ;;  %v3827_v50 = vld [vmem:[%s6293_s2 + $0x10] sm:$0xff] }
0x161a   : > { %v3415_v48 = vpop.f32.mrb[30].mxu1 }
0x161b   : > { %v4533_v18 = vpop.f32.mrb[31].mxu1  ;;  %4537 = vmatmul.mubr.msk.f32.vlgmr.msra.gmra.mrb[32].mxu1 %vm1095_vm2, %v3415_v48  ;;  %v3734_v48 = vrot.slane %v5905_v5, %v5613_v54  ;;  %v4751_v54 = vpack.c.bf16 %v3828_v20, %v3827_v50  ;;  %v3829_v5 = vld [vmem:[%s6293_s2 + $0x20] sm:$0xff] }
0x161c   : > { %4712 = vmatpush3.bf16.msra.mxu1 %v4709_v22  ;;  %4582 = vmatprep.mubr.f32.mxu1 %v3611_v14  ;;  %v3825_v14 = vld [vmem:[%s6293_s2] sm:$0xff]  ;;  %v4754_v21 = vpack.c.bf16 %v3830_v44, %v3829_v5 }
0x161d   : > { %4714 = vmatprep.subr.bf16.mxu1 %v4713_v59  ;;  %v4748_v18 = vpack.c.bf16 %v3826_v15, %v3825_v14 }
0x1620   : > { %4716 = vmatpush3.bf16.msra.mxu1 %v4713_v59 }
0x1621   : > { %4718 = vmatprep.subr.bf16.mxu1 %v4717_v39 }
0x1624   : > { %4720 = vmatpush3.bf16.msra.mxu1 %v4717_v39 }
0x1625   : > { %4722 = vmatprep.subr.bf16.mxu1 %v4721_v23 }
0x1628   : > { %4724 = vmatpush3.bf16.msra.mxu1 %v4721_v23  ;;  %v3832_v23 = vld [vmem:[%s6293_s2 + $0x38] sm:$0xff] }
0x1629   : > { %4726 = vmatprep.subr.bf16.mxu1 %v4725_v29 }
0x162c   : > { %4728 = vmatpush3.bf16.msra.mxu1 %v4725_v29  ;;  %v4760_v29 = vpack.c.bf16 %v3834_v28, %v3833_v27 }
0x162d   : > { %4730 = vmatprep.subr.bf16.mxu1 %v4729_v32 }
0x1630   : > { %4732 = vmatpush3.bf16.msra.mxu1 %v4729_v32  ;;  %v4763_v32 = vpack.c.bf16 %v3836_v60, %v3835_v31 }
0x1631   : > { %4734 = vmatprep.subr.bf16.mxu1 %v4733_v36 }
0x1634   : > { %4736 = vmatpush3.bf16.msra.mxu1 %v4733_v36  ;;  %v4766_v36 = vpack.c.bf16 %v3838_v35, %v3837_v33 }
0x1635   : > { %4738 = vmatprep.subr.bf16.mxu1 %v4737_v4 }
0x1638   : > { %4740 = vmatpush3.bf16.msra.mxu1 %v4737_v4  ;;  %v4769_v4 = vpack.c.bf16 %v3840_v38, %v3839_v37 }
0x163b   : > { %4583 = vmatmul.mubr.f32.vlgmr.msra.gmra.mrb[34].mxu1 %v3612_v24 }
0x16ee   : > { %v3488_v43 = vpop.f32.mrb[32].mxu1 }
0x16ef   : > { %v3492_v49 = vadd.f32 %v3488_v43, %v3245_v30  ;;  %v4538_v51 = vpop.f32.mrb[33].mxu1 }
0x16f1   : > { %v3497_v52 = vadd.f32 %v3496_v45, %v3492_v49 }
0x16f3   : > { %v6011_v55 = vadd.f32 %v4965_v53, %v3497_v52 }
0x16f5   : > { %v3713_v56 = vsel %vm779_vm0, %v6011_v55, 0.0 }
0x16f6   : > { %3714 = vadd.xlane.f32.xlu0 %v3713_v56 }
0x170e   : > { %v4584_v17 = vpop.f32.mrb[34].mxu1 }
0x170f   : > { %v3708_v19 = vadd.f32 %v4584_v17, %v4177_v57  ;;  %v3702_v58 = vpop.f32.mrb[35].mxu1 }
0x1710   : > { %v3703_v47 = vadd.f32 %v4177_v57, %v3702_v58 }
0x1711   : > { %v3712_v61 = vadd.f32 %v3708_v19, %v5782_v63  ;;  %v3737_v63 = vld [vmem:[#allocation8 + $0x8] sm:$0xff] }
0x1712   : > { %v3711_v1 = vadd.f32 %v3703_v47, %v5779_v62  ;;  %v4742_v2 = vpack.c.bf16 %v3737_v63, %v3736_v0  ;;  %v3738_v62 = vld [vmem:[#allocation8 + $0x10] sm:$0xff] }
0x1713   : > { %3920 = vst.msk [vmem:[%s6021_s20 + $0x8] sm:$0xff] %vm779_vm0, %v3712_v61  ;;  %v4745_v9 = vpack.c.bf16 %v3739_v8, %v3738_v62 }
0x1714   : > { %3919 = vst.msk [vmem:[%s6021_s20] sm:$0xff] %vm779_vm0, %v3711_v1  ;;  %4743 = vmatpush3.bf16.msra.mxu0 %v4742_v2 }
0x1715   : > { %4744 = vmatprep.subr.bf16.mxu0 %v5194_v25 }
0x1718   : > { %4746 = vmatpush3.bf16.msra.mxu0 %v4745_v9 }
0x1719   : > { %4747 = vmatprep.subr.bf16.mxu0 %v5194_v25 }
0x1783   : > { %v3715_v3 = vpop.xlane.xlu0 %3714 }
0x1784   : > { %v3716_v11 = vmul.f32 0.03125, %v3715_v3 }
0x1786   : > { %v3717_v22 = vsub.f32 %v6011_v55, %v3716_v11 }
0x1788   : > { %v3718_v6 = vmul.f32 %v3717_v22, %v3717_v22 }
0x178a   : > { %v3719_v7 = vsel %vm779_vm0, %v3718_v6, 0.0 }
0x178b   : > { %3720 = vadd.xlane.f32.xlu1 %v3719_v7 }
0x1818   : > { %v3721_v10 = vpop.xlane.xlu1 %3720 }
0x1819   : > { %v3722_v12 = vmul.f32 0.03125, %v3721_v10 }
0x181b   : > { %v3723_v30 = vadd.f32 1e-05, %v3722_v12 }
0x181d   : > { %4961 = vrsqrt.f32 %v3723_v30 }
0x1827   : > { %v4962_v46 = vpop.eup %4961 }
0x1828   : > { %v3725_v59 = vmul.f32 %v4962_v46, %v3717_v22 }
0x182a   : > { %v3730_v16 = vmul.f32 %v3729_v13, %v3725_v59 }
0x182c   : > { %v3735_v39 = vadd.f32 %v3734_v48, %v3730_v16 }
0x182e   : > { %4594 = vmatmul.mubr.msk.f32.vlgmr.msra.gmra.mrb[22].mxu0 %vm779_vm0, %v3735_v39 }
0x182f   : > { %4749 = vmatpush3.bf16.msra.mxu0 %v4748_v18  ;;  %4628 = vmatprep.mubr.msk.f32.mxu0 %vm5195_vm1, %v5196_v34  ;;  %v3831_v34 = vld [vmem:[%s6293_s2 + $0x30] sm:$0xff]  ;;  %s5200_s2 = smov [#allocation10]  }
0x1830   : > { %4750 = vmatprep.subr.bf16.mxu0 %v5194_v25  ;;  %v4757_v26 = vpack.c.bf16 %v3832_v23, %v3831_v34  ;;  %s5084_s8 = sshll.u32 %s5200_s2, 4  ;;  %s5085_s8 = int_to_ptr.vmem [resolvable:$false] %s5084_s8 }
0x1831   : > { %s5086_s9 = scalar_lea.vmem %s5085_s8, 512  ;;  %p5087_p1 = scmp.lt.s32.totalorder %s6103_s6, %s5085_s8 }
0x1832   : > { %p5088_p2 = scmp.lt.s32.totalorder %s5086_s9, %s5080_s1 }
0x1833   : > { %4752 = vmatpush3.bf16.msra.mxu0 %v4751_v54 }
0x1834   : > { %4753 = vmatprep.subr.bf16.mxu0 %v5194_v25  ;;  %p5089_p4 = por %p5088_p2, %p5087_p1 }
0x1836   : > { %p5090_p0 = pnand %p5089_p4, %p5083_p12 }
0x1837   : > { %4755 = vmatpush3.bf16.msra.mxu0 %v4754_v21 }
0x1838   : > { %4756 = vmatprep.subr.bf16.mxu0 %v5194_v25 }
0x183b   : > { %4758 = vmatpush3.bf16.msra.mxu0 %v4757_v26 }
0x183c   : > { %4759 = vmatprep.subr.bf16.mxu0 %v5194_v25 }
0x183f   : > { %4761 = vmatpush3.bf16.msra.mxu0 %v4760_v29 }
0x1840   : > { %4762 = vmatprep.subr.bf16.mxu0 %v5194_v25 }
0x1843   : > { %4764 = vmatpush3.bf16.msra.mxu0 %v4763_v32 }
0x1844   : > { %4765 = vmatprep.subr.bf16.mxu0 %v5194_v25 }
0x1847   : > { %4767 = vmatpush3.bf16.msra.mxu0 %v4766_v36 }
0x1848   : > { %4768 = vmatprep.subr.bf16.mxu0 %v5194_v25 }
0x184b   : > { %4770 = vmatpush3.bf16.msra.mxu0 %v4769_v4 }
0x1901   : > { %v3816_v41 = vpop.f32.mrb[22].mxu0 }
0x1902   : > { %v3817_v42 = vadd.f32 %v4178_v40, %v3816_v41  ;;  %v4595_v25 = vpop.f32.mrb[23].mxu0 }
0x1904   : > { %v3821_v24 = vmul.f32 0.70710677, %v3817_v42  ;;  %v3820_v43 = vmul.f32 0.5, %v3817_v42 }
0x1906   : > { %4963 = verf.f32 %v3821_v24 }
0x1910   : > { %v4964_v45 = vpop.eup %4963 }
0x1911   : > { %v3823_v49 = vadd.f32 1.0, %v4964_v45 }
0x1913   : > { %v3824_v51 = vmul.f32 %v3823_v49, %v3820_v43 }
0x1915   : > { %4629 = vmatmul.mubr.f32.vlgmr.msra.gmra.mrb[24].mxu0 %v3824_v51 }
0x1916   : > { %5093 = shalt.err (!%p5090_p0)
}
0x1917   : > { %s5094_s20 = scalar_lea.hbm %s6100_s7, 256  ;;  %s5098_s2 = scalar_lea.hbm %s6295_s27, 512 }
0x1918   : > { %p5095_p9 = scmp.ne.s32.totalorder %s6100_s7, %s5094_s20  ;;  %p5099_p13 = scmp.lt.u32.totalorder %s6100_s7, %s6295_s27 }
0x1919   : > { %p5100_p6 = scmp.lt.u32.totalorder %s5098_s2, %s5094_s20  ;;  %p5102_p3 = scmp.lt.u32.totalorder %s5094_s20, %s6100_s7 }
0x191a   : > { %p5096_p11 = pnand %p5095_p9, %p5473_p5 }
0x191b   : > { %p5101_p10 = por %p5100_p6, %p5099_p13 }
0x191c   : > { %p5097_p8 = pneg %p5096_p11 }
0x191d   : > { %p5103_p7 = por %p5102_p3, %p5101_p10 }
0x191f   : > { %p5104_p12 = pnand %p5103_p7, %p5097_p8 }
0x1921   : > { %5107 = shalt.err (!%p5104_p12)
}
0x1922   : > { %s5201_s9 = smov 128   ;;  %s5202_s1 = smov 8  }
0x1923   : > { %4791 = dma.vmem_to_hbm [thread:$0]  (%p5473_p5), %s6103_s6, 256, %s6100_s7, %s3923_s5, %s5201_s9, %s5201_s9, %s5202_s1  }
0x1924   : > { %s6296_s2 = sld [smem:[#allocation39_spill]]  ;;  %s4185_s20 = sshll.u32 %s5340_s4, 7 }
0x1925   : > { %s6297_s0 = sshll.u32 %s5518_s25, 3  ;;  %s6298_s13 = sld [smem:[#allocation41_spill]] }
0x1926   : > { %s768_s8 = scalar_lea.vmem [#allocation11], %s6297_s0  ;;  %s3928_s4 = scalar_lea.sflag [#allocation12], %s5518_s25 }
0x1927   : > { %s3957_s10 = sshll.u32 %s768_s8, 4  ;;  %s5203_s6 = smov [#allocation11]   ;;  %s6141_s10 = int_to_ptr.vmem [resolvable:$true] %s3957_s10 }
0x1928   : > { %s5108_s7 = scalar_lea.vmem %s6141_s10, 128  ;;  %s5112_s5 = sshll.u32 %s5203_s6, 4  ;;  %s5113_s5 = int_to_ptr.vmem [resolvable:$false] %s5112_s5 }
0x1929   : > { %p5109_p1 = scmp.ne.s32.totalorder %s6141_s10, %s5108_s7  ;;  %s5114_s9 = scalar_lea.vmem %s5113_s5, 256 }
0x192a   : > { %v4180_v52 = vld [vmem:[%s6296_s2] ss:$0 sm:$0xff]  ;;  %p5115_p0 = scmp.lt.s32.totalorder %s6141_s10, %s5113_s5  ;;  %p5116_p9 = scmp.lt.s32.totalorder %s5114_s9, %s5108_s7 }
0x192b   : > { %s6139_s14 = scalar_lea.hbm %s6298_s13, %s4185_s20  ;;  %p5110_p2 = pnand %p5109_p1, %p5473_p5 }
0x192c   : > { %p5117_p11 = por %p5116_p9, %p5115_p0 }
0x192d   : > { %p5111_p4 = pneg %p5110_p2 }
0x192f   : > { %p5118_p8 = pnand %p5117_p11, %p5111_p4 }
0x19e8   : > { %v3914_v53 = vpop.f32.mrb[24].mxu0 }
0x19e9   : > { %v3915_v56 = vadd.f32 %v4180_v52, %v3914_v53  ;;  %v4630_v57 = vpop.f32.mrb[25].mxu0 }
0x19eb   : > { %v3918_v17 = vadd.f32 %v3915_v56, %v6011_v55 }
0x19ed   : > { %3921 = vst.msk [vmem:[%s768_s8] sm:$0xff] %vm779_vm0, %v3918_v17 }
0x19ee   : > { %5121 = shalt.err (!%p5118_p8)
}
0x19ef   : > { %s5122_s11 = scalar_lea.hbm %s6139_s14, 128  ;;  %s5126_s1 = scalar_lea.hbm %s6298_s13, 256 }
0x19f0   : > { %p5123_p13 = scmp.ne.s32.totalorder %s6139_s14, %s5122_s11  ;;  %p5127_p3 = scmp.lt.u32.totalorder %s6139_s14, %s6298_s13 }
0x19f1   : > { %p5128_p7 = scmp.lt.u32.totalorder %s5126_s1, %s5122_s11  ;;  %p5130_p1 = scmp.lt.u32.totalorder %s5122_s11, %s6139_s14 }
0x19f2   : > { %p5124_p6 = pnand %p5123_p13, %p5473_p5 }
0x19f3   : > { %p5129_p12 = por %p5128_p7, %p5127_p3 }
0x19f4   : > { %p5125_p10 = pneg %p5124_p6 }
0x19f5   : > { %p5131_p2 = por %p5130_p1, %p5129_p12 }
0x19f7   : > { %p5132_p4 = pnand %p5131_p2, %p5125_p10 }
0x19f9   : > { %5135 = shalt.err (!%p5132_p4)
}
0x19fa   : > { %4792 = dma.vmem_to_hbm [thread:$0]  (%p5473_p5), %s6141_s10, 128, %s6139_s14, %s3928_s4  }
0x19fb PF: > { %s6299_s2 = sld [smem:[#allocation18_spill]]  ;;  %s6300_s20 = sld [smem:[#allocation19_spill]] }
0x19fc   : > { %p6302_p9 = scmp.ge.s32.totalorder %s5186_s30, 2 }
0x1a01   : > { %s3969_s0 = sand.u32 1, %s6299_s2   ;;  %p6301_p0 = scmp.ne.s32.totalorder %s6300_s20, 0 }
0x1a02   : > { %s3970_s8 = scalar_lea.sflag [#allocation4], %s3969_s0 }
0x1a03   : > { %p4810_p11 = pnand %p6302_p9, %p6301_p0 }
0x1a05   : > { %5165 = dma.done.wait (!%p4810_p11), %s3970_s8, 256  }
0x1a06   : > { %5167 = vsyncadd (!%p4810_p11), %s3970_s8, 4294967040  ;;  %s3979_s7 = scalar_lea.sflag [#allocation12], %s3969_s0 }
0x1a07   : > { %5169 = dma.done.wait (!%p4810_p11), %s3979_s7, 128  }
0x1a08   : > { %5171 = vsyncadd (!%p4810_p11), %s3979_s7, 4294967168  ;;  %p41_p5 = scmp.ge.s32.totalorder %s5459_s19, 4   ;;  %s6303_s3 = smov %s5178_s28 }
0x1a09   : > { %s6304_s28 = smov %s5182_s29  ;;  %s6305_s29 = smov %s5469_s16 }
0x1a0a   : > { %s6306_s30 = smov %s5459_s19  ;;  %43 = sbr.rel (!%p41_p5) target bundleno = 32 (0x20), region = 181 }
0x1a11   :  { %3984 = vsyncpa [#allocation3], 1 }
0x1a12   :  { %3986 = vsyncpa [#allocation3 + $0x1], 1 }
0x1a13   :  { %3987 = vsyncpa [#allocation6], 1 }
0x1a14   :  { %3988 = vsyncpa [#allocation9], 1 }
0x1a15   :  { %3989 = vsyncpa [#allocation4], 1 }
0x1a16   :  { %3991 = vsyncpa [#allocation4 + $0x1], 1 }
0x1a17   :  { %3992 = vsyncpa [#allocation12], 1 }
0x1a18   :  { %3994 = vsyncpa [#allocation12 + $0x1], 1 }

</bundles_post_ra>
